<compile_context>
chip_gen: v7x
topology: tpu7x:2x2x1
jax: 0.10.0
libtpu: 0.0.40
codegen_flags: <defaults>
</compile_context>

<pallas_src>
import functools

import jax
import jax.numpy as jnp
from jax.experimental import pallas as pl
from jax.experimental.pallas import tpu as pltpu


def dpattention_kernel(x_ref, w1t_ref, w2t_ref, sgew_ref, sgeb_ref, o_ref,
                       *, cg2, sge_groups, hw_true, pad):
    """One block of T group-samples: x_ref is (T, Cg, HWp).

    Channels [0, cg2) -> SE branch, channels [cg2, 2*cg2) -> SGE branch.
    Writes directly into o_ref (no concatenated intermediates).
    """
    inv_hw = 1.0 / float(hw_true)
    cs = cg2 // sge_groups              # channels per SGE sub-group

    # ------------------ SE branch (channel attention) ------------------
    x1 = x_ref[:, :cg2, :].astype(jnp.float32)                    # (T, Cg2, HWp)
    pooled = jnp.sum(x1, axis=-1) * inv_hw                        # (T, Cg2)
    h = jnp.maximum(
        jnp.dot(pooled, w1t_ref[...], preferred_element_type=jnp.float32), 0.0)
    s = jax.nn.sigmoid(
        jnp.dot(h, w2t_ref[...], preferred_element_type=jnp.float32))  # (T, Cg2)
    o_ref[:, :cg2, :] = (x1 * s[:, :, None]).astype(o_ref.dtype)

    # -------------- SGE branch (spatial group enhance) -----------------
    for g in range(sge_groups):
        c0 = cg2 + g * cs
        xg = x_ref[:, c0:c0 + cs, :].astype(jnp.float32)          # (T, Cs, HWp)
        mg = jnp.sum(xg, axis=-1, keepdims=True) * inv_hw         # (T, Cs, 1)
        xng = xg * mg                                             # (T, Cs, HWp)
        tg = jnp.sum(xng, axis=1, keepdims=True)                  # (T, 1, HWp)

        mu = jnp.sum(tg, axis=-1, keepdims=True) * inv_hw         # (T, 1, 1)
        tc = tg - mu
        ss = jnp.sum(tc * tc, axis=-1, keepdims=True)             # (T, 1, 1)
        if pad > 0:
            # padded lanes hold tg == 0 -> tc == -mu; remove their contribution
            ss = ss - float(pad) * mu * mu
        std = jnp.sqrt(ss * (1.0 / float(hw_true - 1)))           # unbiased std
        # divide only on the tiny (T,1,1) vector, multiply on the big tile
        inv_std = pl.reciprocal(std + 1e-5, approx=False)
        tn = tc * inv_std
        sig = jax.nn.sigmoid(tn * sgew_ref[g] + sgeb_ref[g])      # (T, 1, HWp)
        o_ref[:, c0:c0 + cs, :] = (xg * sig).astype(o_ref.dtype)


def _pick_tile(bg, bytes_per_sample, *, max_bytes=4 << 20, max_t=256):
    """Largest T with T*bytes_per_sample <= max_bytes, keeping >=2 grid steps.

    BG is padded up to a multiple of T by the wrapper, so T need not divide BG.
    """
    cap = max(1, min(max_t, max_bytes // max(bytes_per_sample, 1)))
    if bg >= 2:
        cap = min(cap, (bg + 1) // 2)   # >=2 grid steps (v7x has 2 TensorCores)
    return max(1, min(cap, bg))


@functools.partial(jax.jit, static_argnames=("groups", "sge_groups"))
def dpattention(x, w1, w2, sge_w, sge_b, *, groups=4, sge_groups=4):
    B, C, H, W = x.shape
    assert C % groups == 0
    Cg = C // groups
    assert Cg % 2 == 0
    Cg2 = Cg // 2
    assert Cg2 % sge_groups == 0
    BG = B * groups
    HW = H * W
    assert HW > 1, "unbiased std needs H*W > 1"
    HWp = ((HW + 127) // 128) * 128        # lane-dense last dim
    pad = HWp - HW

    T = _pick_tile(BG, Cg * HWp * x.dtype.itemsize)
    grid = pl.cdiv(BG, T)
    BGp = grid * T
    pad_bg = BGp - BG

    xr = x.reshape(BG, Cg, HW)
    if pad or pad_bg:
        xr = jnp.pad(xr, ((0, pad_bg), (0, 0), (0, pad)))

    # Pre-transpose the tiny SE weights so the kernel does plain (T,K)@(K,N).
    w1t = w1.T        # (Cg2, hidden)
    w2t = w2.T        # (hidden, Cg2)

    kernel = functools.partial(dpattention_kernel, cg2=Cg2,
                               sge_groups=sge_groups, hw_true=HW, pad=pad)

    out = pl.pallas_call(
        kernel,
        out_shape=jax.ShapeDtypeStruct((BGp, Cg, HWp), x.dtype),
        grid=(grid,),
        in_specs=[
            pl.BlockSpec((T, Cg, HWp), lambda i: (i, 0, 0)),        # x block
            pl.BlockSpec(w1t.shape, lambda i: (0, 0)),              # SE fc1 (T)
            pl.BlockSpec(w2t.shape, lambda i: (0, 0)),              # SE fc2 (T)
            pl.BlockSpec(memory_space=pltpu.MemorySpace.SMEM),      # SGE weight
            pl.BlockSpec(memory_space=pltpu.MemorySpace.SMEM),      # SGE bias
        ],
        out_specs=pl.BlockSpec((T, Cg, HWp), lambda i: (i, 0, 0)),
        compiler_params=pltpu.CompilerParams(
            dimension_semantics=("parallel",),
            # ~4 MiB blocks * (2 in + 2 out buffers) + f32 working set stays
            # well under 48 MiB, which is safe on v7x (64 MiB physical VMEM)
            # and lifts the 16/32 MiB scoped defaults on v5e/v6e.
            vmem_limit_bytes=48 * 1024 * 1024,
        ),
    )(xr, w1t, w2t, sge_w, sge_b)

    if pad or pad_bg:
        out = out[:BG, :, :HW]
    return out.reshape(B, C, H, W)


def dpattention_ref(x, w1, w2, sge_w, sge_b, groups, sge_groups):
    """Pure-JAX reference mirroring the PyTorch forward."""
    B, C, H, W = x.shape
    BG, Cg = B * groups, C // groups
    Cg2 = Cg // 2
    xg = x.reshape(BG, Cg, H, W)
    x1, x2 = xg[:, :Cg2], xg[:, Cg2:]

    # SENet
    y = x1.mean(axis=(2, 3))                         # (BG, Cg2)
    h = jnp.maximum(y @ w1.T, 0.0)
    s = jax.nn.sigmoid(h @ w2.T)
    x1o = x1 * s[:, :, None, None]

    # SpatialGroupEnhance
    Cs = Cg2 // sge_groups
    xs = x2.reshape(BG * sge_groups, Cs, H, W)
    m = xs.mean(axis=(2, 3), keepdims=True)
    xn = (xs * m).sum(axis=1, keepdims=True)
    t = xn.reshape(BG * sge_groups, H * W)
    t = t - t.mean(axis=1, keepdims=True)
    std = jnp.std(t, axis=1, keepdims=True, ddof=1) + 1e-5
    t = (t / std).reshape(BG, sge_groups, H, W)
    t = t * sge_w.reshape(1, sge_groups, 1, 1) + sge_b.reshape(1, sge_groups, 1, 1)
    t = t.reshape(BG * sge_groups, 1, H, W)
    x2o = (xs * jax.nn.sigmoid(t)).reshape(BG, Cg2, H, W)

    return jnp.concatenate([x1o, x2o], axis=1).reshape(B, C, H, W)


if __name__ == "__main__":
    # Small shapes consistent with the module structure.
    B, C, H, W = 2, 64, 16, 16
    GROUPS = 4            # Dpattention groups
    SGE_GROUPS = 4        # SpatialGroupEnhance groups
    Cg2 = C // GROUPS // 2        # channels per branch = 8
    HIDDEN = max(Cg2 // 4, 1)     # SE reduction ratio = 4 -> hidden = 2

    key = jax.random.PRNGKey(0)
    kx, k1, k2, k3, k4 = jax.random.split(key, 5)
    x = jax.random.normal(kx, (B, C, H, W), dtype=jnp.float32)
    w1 = jax.random.normal(k1, (HIDDEN, Cg2), dtype=jnp.float32) * 0.3   # SE fc1 (no bias)
    w2 = jax.random.normal(k2, (Cg2, HIDDEN), dtype=jnp.float32) * 0.3   # SE fc2 (no bias)
    # SGE weight/bias (torch init is zeros/ones; random here to exercise the path)
    sge_w = jax.random.normal(k3, (SGE_GROUPS,), dtype=jnp.float32) * 0.5
    sge_b = 1.0 + 0.1 * jax.random.normal(k4, (SGE_GROUPS,), dtype=jnp.float32)

    out = dpattention(x, w1, w2, sge_w, sge_b, groups=GROUPS, sge_groups=SGE_GROUPS)
    out = jax.block_until_ready(out)

    ref = dpattention_ref(x, w1, w2, sge_w, sge_b, GROUPS, SGE_GROUPS)
    assert out.shape == (B, C, H, W)
    assert jnp.allclose(out, ref, atol=1e-5, rtol=1e-4), "mismatch vs JAX reference"

    print("KERNEL_OK")
</pallas_src>

<mosaic_0001>
module attributes {stable_mosaic.version = 11 : i64} {
  func.func @dpattention_kernel(%arg0: i32, %arg1: memref<4x16x256xf32, #tpu.memory_space<vmem>>, %arg2: memref<8x2xf32, #tpu.memory_space<vmem>>, %arg3: memref<2x8xf32, #tpu.memory_space<vmem>>, %arg4: memref<4xf32, #tpu.memory_space<smem>>, %arg5: memref<4xf32, #tpu.memory_space<smem>>, %arg6: memref<4x16x256xf32, #tpu.memory_space<vmem>>) attributes {dimension_semantics = [#tpu.dimension_semantics<parallel>], iteration_bounds = array<i64: 2>, scalar_prefetch = 0 : i64, scratch_operands = 0 : i64, tpu.core_type = #tpu.core_type<tc>, window_params = [{transform_indices = @transform_0, window_bounds = array<i64: 4, 16, 256>}, {pipeline_mode = #tpu.pipeline_mode<synchronous>, transform_indices = @transform_1, window_bounds = array<i64: 8, 2>}, {pipeline_mode = #tpu.pipeline_mode<synchronous>, transform_indices = @transform_2, window_bounds = array<i64: 2, 8>}, {transform_indices = @transform_3, window_bounds = array<i64: 4>}, {transform_indices = @transform_4, window_bounds = array<i64: 4>}, {transform_indices = @transform_5, window_bounds = array<i64: 4, 16, 256>}]} {
    %c0 = arith.constant 0 : index
    %c0_0 = arith.constant 0 : index
    %c0_1 = arith.constant 0 : index
    %0 = vector.load %arg1[%c0, %c0_0, %c0_1] : memref<4x16x256xf32, #tpu.memory_space<vmem>>, vector<4x8x256xf32>
    %cst = arith.constant dense<0.000000e+00> : vector<4x8xf32>
    %1 = vector.multi_reduction <add>, %0, %cst [2] : vector<4x8x256xf32> to vector<4x8xf32>
    %cst_2 = arith.constant 3.906250e-03 : f32
    %2 = vector.broadcast %cst_2 : f32 to vector<4x8xf32>
    %3 = arith.mulf %1, %2 : vector<4x8xf32>
    %c0_3 = arith.constant 0 : index
    %c0_4 = arith.constant 0 : index
    %4 = vector.load %arg2[%c0_3, %c0_4] : memref<8x2xf32, #tpu.memory_space<vmem>>, vector<8x2xf32>
    %cst_5 = arith.constant dense<0.000000e+00> : vector<4x2xf32>
    %5 = tpu.matmul %3, %4, %cst_5 {dimension_numbers = #tpu.dot_dimension_numbers<[1], [0], [0], [1], [0, 0, 1, 1], [], []>} : vector<4x8xf32>, vector<8x2xf32>, vector<4x2xf32> -> vector<4x2xf32>
    %cst_6 = arith.constant 0.000000e+00 : f32
    %6 = vector.broadcast %cst_6 : f32 to vector<4x2xf32>
    %7 = arith.maximumf %5, %6 : vector<4x2xf32>
    %c0_7 = arith.constant 0 : index
    %c0_8 = arith.constant 0 : index
    %8 = vector.load %arg3[%c0_7, %c0_8] : memref<2x8xf32, #tpu.memory_space<vmem>>, vector<2x8xf32>
    %cst_9 = arith.constant dense<0.000000e+00> : vector<4x8xf32>
    %9 = tpu.matmul %7, %8, %cst_9 {dimension_numbers = #tpu.dot_dimension_numbers<[1], [0], [0], [1], [0, 0, 1, 1], [], []>} : vector<4x2xf32>, vector<2x8xf32>, vector<4x8xf32> -> vector<4x8xf32>
    %10 = arith.negf %9 : vector<4x8xf32>
    %11 = math.exp %10 : vector<4x8xf32>
    %cst_10 = arith.constant 1.000000e+00 : f32
    %12 = vector.broadcast %cst_10 : f32 to vector<4x8xf32>
    %13 = arith.addf %12, %11 : vector<4x8xf32>
    %14 = arith.divf %12, %13 : vector<4x8xf32>
    %15 = vector.shape_cast %14 : vector<4x8xf32> to vector<4x8x1xf32>
    %16 = vector.broadcast %15 : vector<4x8x1xf32> to vector<4x8x256xf32>
    %17 = arith.mulf %0, %16 : vector<4x8x256xf32>
    %c0_11 = arith.constant 0 : index
    %c0_12 = arith.constant 0 : index
    %c0_13 = arith.constant 0 : index
    %18 = vector.load %arg6[%c0_11, %c0_12, %c0_13] : memref<4x16x256xf32, #tpu.memory_space<vmem>>, vector<4x8x256xf32>
    tpu.vector_store %arg6[%c0_11, %c0_12, %c0_13], %17 {strides = array<i32>} : memref<4x16x256xf32, #tpu.memory_space<vmem>>, vector<4x8x256xf32>,
    %c0_14 = arith.constant 0 : index
    %c8 = arith.constant 8 : index
    %c0_15 = arith.constant 0 : index
    %19 = vector.load %arg1[%c0_14, %c8, %c0_15] : memref<4x16x256xf32, #tpu.memory_space<vmem>>, vector<4x2x256xf32>
    %cst_16 = arith.constant dense<0.000000e+00> : vector<4x2xf32>
    %20 = vector.multi_reduction <add>, %19, %cst_16 [2] : vector<4x2x256xf32> to vector<4x2xf32>
    %21 = vector.shape_cast %20 : vector<4x2xf32> to vector<4x2x1xf32>
    %cst_17 = arith.constant 3.906250e-03 : f32
    %22 = vector.broadcast %cst_17 : f32 to vector<4x2x1xf32>
    %23 = arith.mulf %21, %22 : vector<4x2x1xf32>
    %24 = vector.broadcast %23 : vector<4x2x1xf32> to vector<4x2x256xf32>
    %25 = arith.mulf %19, %24 : vector<4x2x256xf32>
    %cst_18 = arith.constant dense<0.000000e+00> : vector<4x256xf32>
    %26 = vector.multi_reduction <add>, %25, %cst_18 [1] : vector<4x2x256xf32> to vector<4x256xf32>
    %27 = vector.shape_cast %26 : vector<4x256xf32> to vector<4x1x256xf32>
    %cst_19 = arith.constant dense<0.000000e+00> : vector<4x1xf32>
    %28 = vector.multi_reduction <add>, %27, %cst_19 [2] : vector<4x1x256xf32> to vector<4x1xf32>
    %29 = vector.shape_cast %28 : vector<4x1xf32> to vector<4x1x1xf32>
    %cst_20 = arith.constant 3.906250e-03 : f32
    %30 = vector.broadcast %cst_20 : f32 to vector<4x1x1xf32>
    %31 = arith.mulf %29, %30 : vector<4x1x1xf32>
    %32 = vector.broadcast %31 : vector<4x1x1xf32> to vector<4x1x256xf32>
    %33 = arith.subf %27, %32 : vector<4x1x256xf32>
    %34 = arith.mulf %33, %33 : vector<4x1x256xf32>
    %cst_21 = arith.constant dense<0.000000e+00> : vector<4x1xf32>
    %35 = vector.multi_reduction <add>, %34, %cst_21 [2] : vector<4x1x256xf32> to vector<4x1xf32>
    %36 = vector.shape_cast %35 : vector<4x1xf32> to vector<4x1x1xf32>
    %cst_22 = arith.constant 0.00392156886 : f32
    %37 = vector.broadcast %cst_22 : f32 to vector<4x1x1xf32>
    %38 = arith.mulf %36, %37 : vector<4x1x1xf32>
    %39 = math.sqrt %38 : vector<4x1x1xf32>
    %cst_23 = arith.constant 9.99999974E-6 : f32
    %40 = vector.broadcast %cst_23 : f32 to vector<4x1x1xf32>
    %41 = arith.addf %39, %40 : vector<4x1x1xf32>
    %42 = tpu.reciprocal %41 : vector<4x1x1xf32> -> vector<4x1x1xf32>
    %43 = vector.broadcast %42 : vector<4x1x1xf32> to vector<4x1x256xf32>
    %44 = arith.mulf %33, %43 : vector<4x1x256xf32>
    %c0_24 = arith.constant 0 : index
    %45 = memref.load %arg4[%c0_24] : memref<4xf32, #tpu.memory_space<smem>>
    %46 = vector.broadcast %45 : f32 to vector<4x1x256xf32>
    %47 = arith.mulf %44, %46 : vector<4x1x256xf32>
    %c0_25 = arith.constant 0 : index
    %48 = memref.load %arg5[%c0_25] : memref<4xf32, #tpu.memory_space<smem>>
    %49 = vector.broadcast %48 : f32 to vector<4x1x256xf32>
    %50 = arith.addf %47, %49 : vector<4x1x256xf32>
    %51 = arith.negf %50 : vector<4x1x256xf32>
    %52 = math.exp %51 : vector<4x1x256xf32>
    %cst_26 = arith.constant 1.000000e+00 : f32
    %53 = vector.broadcast %cst_26 : f32 to vector<4x1x256xf32>
    %54 = arith.addf %53, %52 : vector<4x1x256xf32>
    %55 = arith.divf %53, %54 : vector<4x1x256xf32>
    %56 = vector.broadcast %55 : vector<4x1x256xf32> to vector<4x2x256xf32>
    %57 = arith.mulf %19, %56 : vector<4x2x256xf32>
    %c0_27 = arith.constant 0 : index
    %c8_28 = arith.constant 8 : index
    %c0_29 = arith.constant 0 : index
    %58 = vector.load %arg6[%c0_27, %c8_28, %c0_29] : memref<4x16x256xf32, #tpu.memory_space<vmem>>, vector<4x2x256xf32>
    tpu.vector_store %arg6[%c0_27, %c8_28, %c0_29], %57 {strides = array<i32>} : memref<4x16x256xf32, #tpu.memory_space<vmem>>, vector<4x2x256xf32>,
    %c0_30 = arith.constant 0 : index
    %c10 = arith.constant 10 : index
    %c0_31 = arith.constant 0 : index
    %59 = vector.load %arg1[%c0_30, %c10, %c0_31] : memref<4x16x256xf32, #tpu.memory_space<vmem>>, vector<4x2x256xf32>
    %cst_32 = arith.constant dense<0.000000e+00> : vector<4x2xf32>
    %60 = vector.multi_reduction <add>, %59, %cst_32 [2] : vector<4x2x256xf32> to vector<4x2xf32>
    %61 = vector.shape_cast %60 : vector<4x2xf32> to vector<4x2x1xf32>
    %cst_33 = arith.constant 3.906250e-03 : f32
    %62 = vector.broadcast %cst_33 : f32 to vector<4x2x1xf32>
    %63 = arith.mulf %61, %62 : vector<4x2x1xf32>
    %64 = vector.broadcast %63 : vector<4x2x1xf32> to vector<4x2x256xf32>
    %65 = arith.mulf %59, %64 : vector<4x2x256xf32>
    %cst_34 = arith.constant dense<0.000000e+00> : vector<4x256xf32>
    %66 = vector.multi_reduction <add>, %65, %cst_34 [1] : vector<4x2x256xf32> to vector<4x256xf32>
    %67 = vector.shape_cast %66 : vector<4x256xf32> to vector<4x1x256xf32>
    %cst_35 = arith.constant dense<0.000000e+00> : vector<4x1xf32>
    %68 = vector.multi_reduction <add>, %67, %cst_35 [2] : vector<4x1x256xf32> to vector<4x1xf32>
    %69 = vector.shape_cast %68 : vector<4x1xf32> to vector<4x1x1xf32>
    %cst_36 = arith.constant 3.906250e-03 : f32
    %70 = vector.broadcast %cst_36 : f32 to vector<4x1x1xf32>
    %71 = arith.mulf %69, %70 : vector<4x1x1xf32>
    %72 = vector.broadcast %71 : vector<4x1x1xf32> to vector<4x1x256xf32>
    %73 = arith.subf %67, %72 : vector<4x1x256xf32>
    %74 = arith.mulf %73, %73 : vector<4x1x256xf32>
    %cst_37 = arith.constant dense<0.000000e+00> : vector<4x1xf32>
    %75 = vector.multi_reduction <add>, %74, %cst_37 [2] : vector<4x1x256xf32> to vector<4x1xf32>
    %76 = vector.shape_cast %75 : vector<4x1xf32> to vector<4x1x1xf32>
    %cst_38 = arith.constant 0.00392156886 : f32
    %77 = vector.broadcast %cst_38 : f32 to vector<4x1x1xf32>
    %78 = arith.mulf %76, %77 : vector<4x1x1xf32>
    %79 = math.sqrt %78 : vector<4x1x1xf32>
    %cst_39 = arith.constant 9.99999974E-6 : f32
    %80 = vector.broadcast %cst_39 : f32 to vector<4x1x1xf32>
    %81 = arith.addf %79, %80 : vector<4x1x1xf32>
    %82 = tpu.reciprocal %81 : vector<4x1x1xf32> -> vector<4x1x1xf32>
    %83 = vector.broadcast %82 : vector<4x1x1xf32> to vector<4x1x256xf32>
    %84 = arith.mulf %73, %83 : vector<4x1x256xf32>
    %c1 = arith.constant 1 : index
    %85 = memref.load %arg4[%c1] : memref<4xf32, #tpu.memory_space<smem>>
    %86 = vector.broadcast %85 : f32 to vector<4x1x256xf32>
    %87 = arith.mulf %84, %86 : vector<4x1x256xf32>
    %c1_40 = arith.constant 1 : index
    %88 = memref.load %arg5[%c1_40] : memref<4xf32, #tpu.memory_space<smem>>
    %89 = vector.broadcast %88 : f32 to vector<4x1x256xf32>
    %90 = arith.addf %87, %89 : vector<4x1x256xf32>
    %91 = arith.negf %90 : vector<4x1x256xf32>
    %92 = math.exp %91 : vector<4x1x256xf32>
    %cst_41 = arith.constant 1.000000e+00 : f32
    %93 = vector.broadcast %cst_41 : f32 to vector<4x1x256xf32>
    %94 = arith.addf %93, %92 : vector<4x1x256xf32>
    %95 = arith.divf %93, %94 : vector<4x1x256xf32>
    %96 = vector.broadcast %95 : vector<4x1x256xf32> to vector<4x2x256xf32>
    %97 = arith.mulf %59, %96 : vector<4x2x256xf32>
    %c0_42 = arith.constant 0 : index
    %c10_43 = arith.constant 10 : index
    %c0_44 = arith.constant 0 : index
    %98 = vector.load %arg6[%c0_42, %c10_43, %c0_44] : memref<4x16x256xf32, #tpu.memory_space<vmem>>, vector<4x2x256xf32>
    tpu.vector_store %arg6[%c0_42, %c10_43, %c0_44], %97 {strides = array<i32>} : memref<4x16x256xf32, #tpu.memory_space<vmem>>, vector<4x2x256xf32>,
    %c0_45 = arith.constant 0 : index
    %c12 = arith.constant 12 : index
    %c0_46 = arith.constant 0 : index
    %99 = vector.load %arg1[%c0_45, %c12, %c0_46] : memref<4x16x256xf32, #tpu.memory_space<vmem>>, vector<4x2x256xf32>
    %cst_47 = arith.constant dense<0.000000e+00> : vector<4x2xf32>
    %100 = vector.multi_reduction <add>, %99, %cst_47 [2] : vector<4x2x256xf32> to vector<4x2xf32>
    %101 = vector.shape_cast %100 : vector<4x2xf32> to vector<4x2x1xf32>
    %cst_48 = arith.constant 3.906250e-03 : f32
    %102 = vector.broadcast %cst_48 : f32 to vector<4x2x1xf32>
    %103 = arith.mulf %101, %102 : vector<4x2x1xf32>
    %104 = vector.broadcast %103 : vector<4x2x1xf32> to vector<4x2x256xf32>
    %105 = arith.mulf %99, %104 : vector<4x2x256xf32>
    %cst_49 = arith.constant dense<0.000000e+00> : vector<4x256xf32>
    %106 = vector.multi_reduction <add>, %105, %cst_49 [1] : vector<4x2x256xf32> to vector<4x256xf32>
    %107 = vector.shape_cast %106 : vector<4x256xf32> to vector<4x1x256xf32>
    %cst_50 = arith.constant dense<0.000000e+00> : vector<4x1xf32>
    %108 = vector.multi_reduction <add>, %107, %cst_50 [2] : vector<4x1x256xf32> to vector<4x1xf32>
    %109 = vector.shape_cast %108 : vector<4x1xf32> to vector<4x1x1xf32>
    %cst_51 = arith.constant 3.906250e-03 : f32
    %110 = vector.broadcast %cst_51 : f32 to vector<4x1x1xf32>
    %111 = arith.mulf %109, %110 : vector<4x1x1xf32>
    %112 = vector.broadcast %111 : vector<4x1x1xf32> to vector<4x1x256xf32>
    %113 = arith.subf %107, %112 : vector<4x1x256xf32>
    %114 = arith.mulf %113, %113 : vector<4x1x256xf32>
    %cst_52 = arith.constant dense<0.000000e+00> : vector<4x1xf32>
    %115 = vector.multi_reduction <add>, %114, %cst_52 [2] : vector<4x1x256xf32> to vector<4x1xf32>
    %116 = vector.shape_cast %115 : vector<4x1xf32> to vector<4x1x1xf32>
    %cst_53 = arith.constant 0.00392156886 : f32
    %117 = vector.broadcast %cst_53 : f32 to vector<4x1x1xf32>
    %118 = arith.mulf %116, %117 : vector<4x1x1xf32>
    %119 = math.sqrt %118 : vector<4x1x1xf32>
    %cst_54 = arith.constant 9.99999974E-6 : f32
    %120 = vector.broadcast %cst_54 : f32 to vector<4x1x1xf32>
    %121 = arith.addf %119, %120 : vector<4x1x1xf32>
    %122 = tpu.reciprocal %121 : vector<4x1x1xf32> -> vector<4x1x1xf32>
    %123 = vector.broadcast %122 : vector<4x1x1xf32> to vector<4x1x256xf32>
    %124 = arith.mulf %113, %123 : vector<4x1x256xf32>
    %c2 = arith.constant 2 : index
    %125 = memref.load %arg4[%c2] : memref<4xf32, #tpu.memory_space<smem>>
    %126 = vector.broadcast %125 : f32 to vector<4x1x256xf32>
    %127 = arith.mulf %124, %126 : vector<4x1x256xf32>
    %c2_55 = arith.constant 2 : index
    %128 = memref.load %arg5[%c2_55] : memref<4xf32, #tpu.memory_space<smem>>
    %129 = vector.broadcast %128 : f32 to vector<4x1x256xf32>
    %130 = arith.addf %127, %129 : vector<4x1x256xf32>
    %131 = arith.negf %130 : vector<4x1x256xf32>
    %132 = math.exp %131 : vector<4x1x256xf32>
    %cst_56 = arith.constant 1.000000e+00 : f32
    %133 = vector.broadcast %cst_56 : f32 to vector<4x1x256xf32>
    %134 = arith.addf %133, %132 : vector<4x1x256xf32>
    %135 = arith.divf %133, %134 : vector<4x1x256xf32>
    %136 = vector.broadcast %135 : vector<4x1x256xf32> to vector<4x2x256xf32>
    %137 = arith.mulf %99, %136 : vector<4x2x256xf32>
    %c0_57 = arith.constant 0 : index
    %c12_58 = arith.constant 12 : index
    %c0_59 = arith.constant 0 : index
    %138 = vector.load %arg6[%c0_57, %c12_58, %c0_59] : memref<4x16x256xf32, #tpu.memory_space<vmem>>, vector<4x2x256xf32>
    tpu.vector_store %arg6[%c0_57, %c12_58, %c0_59], %137 {strides = array<i32>} : memref<4x16x256xf32, #tpu.memory_space<vmem>>, vector<4x2x256xf32>,
    %c0_60 = arith.constant 0 : index
    %c14 = arith.constant 14 : index
    %c0_61 = arith.constant 0 : index
    %139 = vector.load %arg1[%c0_60, %c14, %c0_61] : memref<4x16x256xf32, #tpu.memory_space<vmem>>, vector<4x2x256xf32>
    %cst_62 = arith.constant dense<0.000000e+00> : vector<4x2xf32>
    %140 = vector.multi_reduction <add>, %139, %cst_62 [2] : vector<4x2x256xf32> to vector<4x2xf32>
    %141 = vector.shape_cast %140 : vector<4x2xf32> to vector<4x2x1xf32>
    %cst_63 = arith.constant 3.906250e-03 : f32
    %142 = vector.broadcast %cst_63 : f32 to vector<4x2x1xf32>
    %143 = arith.mulf %141, %142 : vector<4x2x1xf32>
    %144 = vector.broadcast %143 : vector<4x2x1xf32> to vector<4x2x256xf32>
    %145 = arith.mulf %139, %144 : vector<4x2x256xf32>
    %cst_64 = arith.constant dense<0.000000e+00> : vector<4x256xf32>
    %146 = vector.multi_reduction <add>, %145, %cst_64 [1] : vector<4x2x256xf32> to vector<4x256xf32>
    %147 = vector.shape_cast %146 : vector<4x256xf32> to vector<4x1x256xf32>
    %cst_65 = arith.constant dense<0.000000e+00> : vector<4x1xf32>
    %148 = vector.multi_reduction <add>, %147, %cst_65 [2] : vector<4x1x256xf32> to vector<4x1xf32>
    %149 = vector.shape_cast %148 : vector<4x1xf32> to vector<4x1x1xf32>
    %cst_66 = arith.constant 3.906250e-03 : f32
    %150 = vector.broadcast %cst_66 : f32 to vector<4x1x1xf32>
    %151 = arith.mulf %149, %150 : vector<4x1x1xf32>
    %152 = vector.broadcast %151 : vector<4x1x1xf32> to vector<4x1x256xf32>
    %153 = arith.subf %147, %152 : vector<4x1x256xf32>
    %154 = arith.mulf %153, %153 : vector<4x1x256xf32>
    %cst_67 = arith.constant dense<0.000000e+00> : vector<4x1xf32>
    %155 = vector.multi_reduction <add>, %154, %cst_67 [2] : vector<4x1x256xf32> to vector<4x1xf32>
    %156 = vector.shape_cast %155 : vector<4x1xf32> to vector<4x1x1xf32>
    %cst_68 = arith.constant 0.00392156886 : f32
    %157 = vector.broadcast %cst_68 : f32 to vector<4x1x1xf32>
    %158 = arith.mulf %156, %157 : vector<4x1x1xf32>
    %159 = math.sqrt %158 : vector<4x1x1xf32>
    %cst_69 = arith.constant 9.99999974E-6 : f32
    %160 = vector.broadcast %cst_69 : f32 to vector<4x1x1xf32>
    %161 = arith.addf %159, %160 : vector<4x1x1xf32>
    %162 = tpu.reciprocal %161 : vector<4x1x1xf32> -> vector<4x1x1xf32>
    %163 = vector.broadcast %162 : vector<4x1x1xf32> to vector<4x1x256xf32>
    %164 = arith.mulf %153, %163 : vector<4x1x256xf32>
    %c3 = arith.constant 3 : index
    %165 = memref.load %arg4[%c3] : memref<4xf32, #tpu.memory_space<smem>>
    %166 = vector.broadcast %165 : f32 to vector<4x1x256xf32>
    %167 = arith.mulf %164, %166 : vector<4x1x256xf32>
    %c3_70 = arith.constant 3 : index
    %168 = memref.load %arg5[%c3_70] : memref<4xf32, #tpu.memory_space<smem>>
    %169 = vector.broadcast %168 : f32 to vector<4x1x256xf32>
    %170 = arith.addf %167, %169 : vector<4x1x256xf32>
    %171 = arith.negf %170 : vector<4x1x256xf32>
    %172 = math.exp %171 : vector<4x1x256xf32>
    %cst_71 = arith.constant 1.000000e+00 : f32
    %173 = vector.broadcast %cst_71 : f32 to vector<4x1x256xf32>
    %174 = arith.addf %173, %172 : vector<4x1x256xf32>
    %175 = arith.divf %173, %174 : vector<4x1x256xf32>
    %176 = vector.broadcast %175 : vector<4x1x256xf32> to vector<4x2x256xf32>
    %177 = arith.mulf %139, %176 : vector<4x2x256xf32>
    %c0_72 = arith.constant 0 : index
    %c14_73 = arith.constant 14 : index
    %c0_74 = arith.constant 0 : index
    %178 = vector.load %arg6[%c0_72, %c14_73, %c0_74] : memref<4x16x256xf32, #tpu.memory_space<vmem>>, vector<4x2x256xf32>
    tpu.vector_store %arg6[%c0_72, %c14_73, %c0_74], %177 {strides = array<i32>} : memref<4x16x256xf32, #tpu.memory_space<vmem>>, vector<4x2x256xf32>,
    return
  }
  func.func @transform_0(%arg0: i32) -> (i32, i32, i32) {
    %c0_i32 = arith.constant 0 : i32
    %c0_i32_0 = arith.constant 0 : i32
    %c0_i32_1 = arith.constant 0 : i32
    return %arg0, %c0_i32, %c0_i32_0 : i32, i32, i32
  }
  func.func @transform_1(%arg0: i32) -> (i32, i32) {
    %c0_i32 = arith.constant 0 : i32
    %c0_i32_0 = arith.constant 0 : i32
    %c0_i32_1 = arith.constant 0 : i32
    return %c0_i32, %c0_i32_0 : i32, i32
  }
  func.func @transform_2(%arg0: i32) -> (i32, i32) {
    %c0_i32 = arith.constant 0 : i32
    %c0_i32_0 = arith.constant 0 : i32
    %c0_i32_1 = arith.constant 0 : i32
    return %c0_i32, %c0_i32_0 : i32, i32
  }
  func.func @transform_3(%arg0: i32) -> i32 {
    %c0_i32 = arith.constant 0 : i32
    %c0_i32_0 = arith.constant 0 : i32
    return %c0_i32 : i32
  }
  func.func @transform_4(%arg0: i32) -> i32 {
    %c0_i32 = arith.constant 0 : i32
    %c0_i32_0 = arith.constant 0 : i32
    return %c0_i32 : i32
  }
  func.func @transform_5(%arg0: i32) -> (i32, i32, i32) {
    %c0_i32 = arith.constant 0 : i32
    %c0_i32_0 = arith.constant 0 : i32
    %c0_i32_1 = arith.constant 0 : i32
    return %arg0, %c0_i32, %c0_i32_0 : i32, i32, i32
  }
}

</mosaic_0001>

<bundles_post_ra>
// kernel: dpattention.1
= control target key start
LH: loop header
LB: loop body
LE: loop exit
PB: predicated region body
PF: predicated region fallthrough
CT: control target
= control target key end

     0   :  { %10 = vsyncpa [#allocation3], 0  ;;  %s3208_s0 = inlined_call_operand.vmem [shape: f32[8,16,256], index: 0, kind: input, shape index: {}]   ;;  %s3209_s1 = inlined_call_operand.vmem [shape: f32[8,2], index: 1, kind: input, shape index: {}]   ;;  %s3210_s2 = inlined_call_operand.vmem [shape: f32[2,8], index: 2, kind: input, shape index: {}]   ;;  %s3211_s3 = inlined_call_operand.vmem [shape: f32[4], index: 3, kind: input, shape index: {}]   ;;  %s3212_s4 = inlined_call_operand.vmem [shape: f32[4], index: 4, kind: input, shape index: {}]   ;;  %s3213_s5 = inlined_call_operand.vmem [shape: f32[8,16,256], index: 5, kind: output, shape index: {}]  }
   0x1   :  { %11 = vsyncpa [#allocation5], 0  ;;  %s2181_s18 = smov 0  }
   0x2 LB: > { %s1759_s19 = sadd.s32 4294967295, %s2145_s18   ;;  %p1761_p0 = scmp.ge.s32.totalorder %s2145_s18, 1  ;;  %s2145_s18 = sphi %s2181_s18, %s17_s18  }
   0x3   : > { %p158_p1 = scmp.lt.s32.totalorder %s2145_s18, 3  ;;  %s177_s22 = sshll.u32 %s3211_s3, 4  ;;  %s178_s22 = int_to_ptr.vmem [resolvable:$true] %s177_s22 }
   0x4   : > { %p2198_p3 = scmp.eq.s32.totalorder %s1759_s19, 0  ;;  %s188_s27 = sshll.u32 %s3212_s4, 4  ;;  %s189_s27 = int_to_ptr.vmem [resolvable:$true] %s188_s27 }
   0x5   : > { %p2192_p2 = pnand %p1761_p0, %p158_p1  ;;  %s2101_s29 = scalar_lea.vmem %s178_s22, 16 }
   0x6   : > { %s3218_s24 = scalar_select %p2198_p3, 1, 0 }
   0x7   : > { %s3217_s23 = scalar_select %p2192_p2, 1, 0 }
   0x8   : > { %p1842_p4 = pneg %p2192_p2  ;;  %p2102_p6 = scmp.ne.s32.totalorder %s178_s22, %s2101_s29 }
   0x9   : > { %p2109_p10 = scmp.lt.s32.totalorder %s178_s22, %s178_s22  ;;  %p2110_p11 = scmp.lt.s32.totalorder %s2101_s29, %s2101_s29 }
   0xa   : > { %p2209_p5 = pnand %p2198_p3, %p1842_p4 }
   0xb   : > { %p2111_p12 = por %p2110_p11, %p2109_p10 }
   0xc   : > { %p2103_p7 = pneg %p2209_p5 }
   0xe   : > { %p2104_p8 = pnand %p2103_p7, %p2102_p6 }
  0x10   : > { %p2105_p9 = pneg %p2104_p8 }
  0x12   : > { %p2112_p13 = pnand %p2111_p12, %p2105_p9 }
  0x14   : > { %2115 = shalt.err (!%p2112_p13)
}
  0x15   : > { %s2147_s30 = smov [#allocation2]   ;;  %s2116_s6 = scalar_lea.vmem %s189_s27, 16 }
  0x16   : > { %1845 = dma.vmem_to_smem (!%p2209_p5), %s178_s22, 16, %s2147_s30, [#allocation3]  }
  0x17   : > { %p2117_p0 = scmp.ne.s32.totalorder %s189_s27, %s2116_s6  ;;  %p2124_p3 = scmp.lt.s32.totalorder %s189_s27, %s189_s27 }
  0x18   : > { %p2125_p2 = scmp.lt.s32.totalorder %s2116_s6, %s2116_s6 }
  0x19   : > { %p2119_p1 = pnand %p2117_p0, %p2103_p7 }
  0x1a   : > { %p2126_p6 = por %p2125_p2, %p2124_p3 }
  0x1b   : > { %p2120_p4 = pneg %p2119_p1 }
  0x1d   : > { %p2127_p8 = pnand %p2126_p6, %p2120_p4 }
  0x1f   : > { %2130 = shalt.err (!%p2127_p8)
}
  0x20   : > { %s2148_s7 = smov [#allocation4]   ;;  %p3220_p9 = scmp.ne.s32.totalorder %s3217_s23, 0 }
  0x21   : > { %1848 = dma.vmem_to_smem (!%p2209_p5), %s189_s27, 16, %s2148_s7, [#allocation5]  }
  0x22   : > { %211 = sbr.rel (%p3220_p9) target bundleno = 793 (0x319), region = 40  ;;  %p3221_p10 = scmp.ne.s32.totalorder (!%p3220_p9), %s3218_s24, 0 }
  0x29   : > { %2136 = dma.done.wait (%p3221_p10), [#allocation3], 16  }
  0x2a   : > { %2138 = vsyncadd (%p3221_p10), [#allocation3], 4294967280 }
  0x2b   : > { %2140 = dma.done.wait (%p3221_p10), [#allocation5], 16  }
  0x2c   : > { %2142 = vsyncadd (%p3221_p10), [#allocation5], 4294967280 }
  0x2d   : > { %221 = sfence }
  0x2e   : > { %s1768_s8 = sshll.u32 %s1759_s19, 2  ;;  %vm796_vm0 = vcmask 1043458   ;;  %vm1093_vm1 = vcmask 1045508   ;;  %vm1390_vm2 = vcmask 1047558   ;;  %vm392_vm3 = vcmask 1041408   ;;  %s1786_s17 = sld [smem:[#allocation2 + $0x1]] }
  0x2f   : > { %p247_p2 = scmp.lt.s32.totalorder %s1768_s8, 7  ;;  %vm2150_vm4 = vmmov 0   ;;  %vm307_vm5 = vcmask 1041409   ;;  %vm309_vm6 = vcmask 1042434   ;;  %vm311_vm7 = vcmask 1043459   ;;  %s1787_s19 = sld [smem:[#allocation4 + $0x1]] }
  0x30   : > { %vm313_vm8 = vcmask 64512   ;;  %vm388_vm9 = vcmask 15360   ;;  %s1806_s20 = sld [smem:[#allocation2 + $0x3]]  ;;  %s2920_s22 = sld [smem:[#allocation2]] }
  0x31   : > { %s3223_s8 = smov (!%p247_p2, %s1768_s8), 7  ;;  %s1807_s21 = sld [smem:[#allocation4 + $0x3]] }
  0x32   : > { %s1818_s9 = sshll.u32 %s3223_s8, 5  ;;  %s2932_s23 = sld [smem:[#allocation4]] }
  0x33   : > { %s2239_s12 = scalar_lea.vmem %s3208_s0, %s1818_s9  ;;  %s3015_s26 = scalar_lea.vmem %s3213_s5, %s1818_s9 }
  0x34   : > { %v260_v0 = vld [vmem:[%s2239_s12] sm:$0xff]  ;;  %v261_v1 = vld [vmem:[%s2239_s12 + $0x8] sm:$0xff]  ;;  %v2250_v10 = vld [vmem:[%s2239_s12 + $0x10] sm:$0xc]  ;;  %s1796_s27 = sld [smem:[#allocation2 + $0x2]] }
  0x35   : > { %v264_v2 = vld [vmem:[%s2239_s12 + $0x40] sm:$0xff]  ;;  %v268_v3 = vadd.f32 %v261_v1, %v260_v0  ;;  %v265_v4 = vld [vmem:[%s2239_s12 + $0x48] sm:$0xff]  ;;  %v2253_v12 = vld [vmem:[%s2239_s12 + $0x18] sm:$0xc]  ;;  %v797_v15 = vsel %vm796_vm0, %v2250_v10, 0.0  ;;  %s1797_s28 = sld [smem:[#allocation4 + $0x2]] }
  0x36   : > { %v262_v5 = vld [vmem:[%s2239_s12 + $0x20] sm:$0xff]  ;;  %v263_v6 = vld [vmem:[%s2239_s12 + $0x28] sm:$0xff]  ;;  %v274_v7 = vadd.f32 %v265_v4, %v264_v2  ;;  %v2256_v13 = vld [vmem:[%s2239_s12 + $0x10] sm:$0x30]  ;;  %v798_v16 = vsel %vm796_vm0, %v2253_v12, 0.0 }
  0x37   : > { %v266_v8 = vld [vmem:[%s2239_s12 + $0x60] sm:$0xff]  ;;  %v267_v9 = vld [vmem:[%s2239_s12 + $0x68] sm:$0xff]  ;;  %269 = vadd.xlane.f32.xlu0 %v268_v3  ;;  %v271_v11 = vadd.f32 %v263_v6, %v262_v5  ;;  %v2263_v17 = vld [vmem:[%s2239_s12 + $0x18] sm:$0x30]  ;;  %v1094_v18 = vsel %vm1093_vm1, %v2256_v13, 0.0  ;;  %v799_v24 = vadd.f32 %v798_v16, %v797_v15 }
  0x38   : > { %275 = vadd.xlane.f32.xlu1 %v274_v7  ;;  %v277_v14 = vadd.f32 %v267_v9, %v266_v8  ;;  %v1095_v19 = vsel %vm1093_vm1, %v2263_v17, 0.0  ;;  %v2270_v20 = vld [vmem:[%s2239_s12 + $0x10] sm:$0xc0]  ;;  %v2273_v21 = vld [vmem:[%s2239_s12 + $0x18] sm:$0xc0] }
  0x39   : > { %v2276_v22 = vld [vmem:[%s2239_s12 + $0x30] sm:$0xc]  ;;  %v2279_v23 = vld [vmem:[%s2239_s12 + $0x38] sm:$0xc]  ;;  %v1096_v25 = vadd.f32 %v1095_v19, %v1094_v18  ;;  %v1391_v26 = vsel %vm1390_vm2, %v2270_v20, 0.0  ;;  %v1392_v27 = vsel %vm1390_vm2, %v2273_v21, 0.0 }
  0x3a   : > { %v802_v28 = vsel %vm796_vm0, %v2276_v22, 0.0  ;;  %v803_v29 = vsel %vm796_vm0, %v2279_v23, 0.0  ;;  %v2290_v30 = vld [vmem:[%s2239_s12 + $0x30] sm:$0x30]  ;;  %v2293_v31 = vld [vmem:[%s2239_s12 + $0x38] sm:$0x30]  ;;  %v1393_v34 = vadd.f32 %v1392_v27, %v1391_v26 }
  0x3b   : > { %272 = vadd.xlane.f32.xlu0 %v271_v11  ;;  %v2296_v32 = vld [vmem:[%s2239_s12 + $0x30] sm:$0xc0]  ;;  %v2299_v33 = vld [vmem:[%s2239_s12 + $0x38] sm:$0xc0]  ;;  %v804_v35 = vadd.f32 %v803_v29, %v802_v28  ;;  %v1099_v36 = vsel %vm1093_vm1, %v2290_v30, 0.0  ;;  %v1100_v37 = vsel %vm1093_vm1, %v2293_v31, 0.0 }
  0x3c   : > { %278 = vadd.xlane.f32.xlu1 %v277_v14  ;;  %v1396_v38 = vsel %vm1390_vm2, %v2296_v32, 0.0  ;;  %v1397_v39 = vsel %vm1390_vm2, %v2299_v33, 0.0  ;;  %v2310_v40 = vld [vmem:[%s2239_s12 + $0x10] sm:$0x3]  ;;  %v2313_v41 = vld [vmem:[%s2239_s12 + $0x18] sm:$0x3]  ;;  %v1101_v44 = vadd.f32 %v1100_v37, %v1099_v36 }
  0x3d   : > { %v2316_v42 = vld [vmem:[%s2239_s12 + $0x50] sm:$0xc]  ;;  %v2319_v43 = vld [vmem:[%s2239_s12 + $0x58] sm:$0xc]  ;;  %v1398_v45 = vadd.f32 %v1397_v39, %v1396_v38  ;;  %v524_v46 = vsel %vm392_vm3, %v2310_v40, 0.0  ;;  %v525_v47 = vsel %vm392_vm3, %v2313_v41, 0.0 }
  0x3e   : > { %v807_v48 = vsel %vm796_vm0, %v2316_v42, 0.0  ;;  %v808_v49 = vsel %vm796_vm0, %v2319_v43, 0.0  ;;  %v2330_v50 = vld [vmem:[%s2239_s12 + $0x50] sm:$0x30]  ;;  %v2333_v51 = vld [vmem:[%s2239_s12 + $0x58] sm:$0x30]  ;;  %v526_v54 = vadd.f32 %v525_v47, %v524_v46  ;;  %v289_v46 = vlaneseq }
  0x3f   : > { %800 = vadd.xlane.f32.xlu0 %v799_v24  ;;  %v2336_v52 = vld [vmem:[%s2239_s12 + $0x50] sm:$0xc0]  ;;  %v2339_v53 = vld [vmem:[%s2239_s12 + $0x58] sm:$0xc0]  ;;  %v809_v55 = vadd.f32 %v808_v49, %v807_v48  ;;  %v1104_v56 = vsel %vm1093_vm1, %v2330_v50, 0.0  ;;  %v1105_v57 = vsel %vm1093_vm1, %v2333_v51, 0.0 }
  0x40   : > { %1097 = vadd.xlane.f32.xlu1 %v1096_v25  ;;  %v2346_v58 = vld [vmem:[%s2239_s12 + $0x30] sm:$0x3]  ;;  %v1401_v59 = vsel %vm1390_vm2, %v2336_v52, 0.0  ;;  %v1402_v60 = vsel %vm1390_vm2, %v2339_v53, 0.0  ;;  %v2353_v61 = vld [vmem:[%s2239_s12 + $0x38] sm:$0x3]  ;;  %v1106_v0 = vadd.f32 %v1105_v57, %v1104_v56 }
  0x41   : > { %v2356_v62 = vld [vmem:[%s2239_s12 + $0x70] sm:$0xc]  ;;  %v2359_v63 = vld [vmem:[%s2239_s12 + $0x78] sm:$0xc]  ;;  %v1403_v1 = vadd.f32 %v1402_v60, %v1401_v59  ;;  %v529_v2 = vsel %vm392_vm3, %v2346_v58, 0.0  ;;  %v530_v3 = vsel %vm392_vm3, %v2353_v61, 0.0 }
  0x42   : > { %v812_v4 = vsel %vm796_vm0, %v2356_v62, 0.0  ;;  %v813_v5 = vsel %vm796_vm0, %v2359_v63, 0.0  ;;  %v2370_v6 = vld [vmem:[%s2239_s12 + $0x70] sm:$0x30]  ;;  %v2373_v7 = vld [vmem:[%s2239_s12 + $0x78] sm:$0x30]  ;;  %v531_v15 = vadd.f32 %v530_v3, %v529_v2 }
  0x43   : > { %1394 = vadd.xlane.f32.xlu0 %v1393_v34  ;;  %v2376_v8 = vld [vmem:[%s2239_s12 + $0x70] sm:$0xc0]  ;;  %v2379_v9 = vld [vmem:[%s2239_s12 + $0x78] sm:$0xc0]  ;;  %v2149_v11 = vmov 0.0   ;;  %v284_v14 = vld [vmem:[%s3209_s1] sm:$0xff]  ;;  %v814_v16 = vadd.f32 %v813_v5, %v812_v4 }
  0x44   : > { %805 = vadd.xlane.f32.xlu1 %v804_v35  ;;  %1824 = vmatprep.subr.mxu0 %v2149_v11  ;;  %v1109_v18 = vsel %vm1093_vm1, %v2370_v6, 0.0  ;;  %v1110_v19 = vsel %vm1093_vm1, %v2373_v7, 0.0  ;;  %v1406_v24 = vsel %vm1390_vm2, %v2376_v8, 0.0  ;;  %v1407_v25 = vsel %vm1390_vm2, %v2379_v9, 0.0  ;;  %v2393_v26 = vld [vmem:[%s2239_s12 + $0x50] sm:$0x3] }
  0x45   : > { %1829 = vmatprep.subr.mxu1 %v2149_v11  ;;  %1825 = vmatpush3.msra.mxu0 %v284_v14  ;;  %v2396_v27 = vld [vmem:[%s2239_s12 + $0x58] sm:$0x3]  ;;  %v2399_v28 = vld [vmem:[%s2239_s12 + $0x70] sm:$0x3]  ;;  %v1111_v34 = vadd.f32 %v1110_v19, %v1109_v18  ;;  %v1408_v35 = vadd.f32 %v1407_v25, %v1406_v24  ;;  %v534_v36 = vsel %vm392_vm3, %v2393_v26, 0.0  ;;  %v290_v47 = vand.u32 127, %v289_v46 }
  0x46   : > { %1826 = vmatprep.mubr.msk.f32.mxu0 %vm2150_vm4, %v2149_v11  ;;  %1831 = vmatprep.mubr.msk.f32.mxu1 %vm2150_vm4, %v2149_v11  ;;  %v2402_v29 = vld [vmem:[%s2239_s12 + $0x78] sm:$0x3]  ;;  %v535_v37 = vsel %vm392_vm3, %v2396_v27, 0.0  ;;  %v539_v38 = vsel %vm392_vm3, %v2399_v28, 0.0  ;;  %v2412_v48 = vshrl.u32 %v289_v46, 7 }
  0x47   : > { %1102 = vadd.xlane.f32.xlu0 %v1101_v44  ;;  %v540_v39 = vsel %vm392_vm3, %v2402_v29, 0.0  ;;  %v536_v44 = vadd.f32 %v535_v37, %v534_v36 }
  0x48   : > { %1399 = vadd.xlane.f32.xlu1 %v1398_v45  ;;  %v541_v45 = vadd.f32 %v540_v39, %v539_v38 }
  0x4b   : > { %527 = vadd.xlane.f32.xlu0 %v526_v54 }
  0x4c   : > { %810 = vadd.xlane.f32.xlu1 %v809_v55  ;;  %v293_v55 = vsub.s32 %v290_v47, %v2412_v48 }
  0x4f   : > { %1107 = vadd.xlane.f32.xlu0 %v1106_v0 }
  0x50   : > { %1404 = vadd.xlane.f32.xlu1 %v1403_v1 }
  0x53   : > { %532 = vadd.xlane.f32.xlu0 %v531_v15 }
  0x54   : > { %815 = vadd.xlane.f32.xlu1 %v814_v16 }
  0x57   : > { %1112 = vadd.xlane.f32.xlu0 %v1111_v34 }
  0x58   : > { %1409 = vadd.xlane.f32.xlu1 %v1408_v35 }
  0x5b   : > { %537 = vadd.xlane.f32.xlu0 %v536_v44 }
  0x5c   : > { %542 = vadd.xlane.f32.xlu1 %v541_v45 }
  0xc4   : > { %v270_v49 = vpop.xlane.xlu0 %269 }
  0xc5   : > { %v276_v54 = vpop.xlane.xlu1 %275  ;;  %v280_v56 = vmul.f32 0.00390625, %v270_v49 }
  0xc6   : > { %v282_v57 = vmul.f32 0.00390625, %v276_v54 }
  0xc7   : > { %v294_v2 = vrot.slane %v280_v56, %v293_v55 }
  0xc8   : > { %v273_v59 = vpop.xlane.xlu0 %272  ;;  %v302_v4 = vrot.slane %v282_v57, %v293_v55 }
  0xc9   : > { %v281_v60 = vmul.f32 0.00390625, %v273_v59  ;;  %v279_v0 = vpop.xlane.xlu1 %278 }
  0xca   : > { %v283_v1 = vmul.f32 0.00390625, %v279_v0 }
  0xcb   : > { %v298_v3 = vrot.slane %v281_v60, %v293_v55 }
  0xcc   : > { %v306_v5 = vrot.slane %v283_v1, %v293_v55  ;;  %v801_v11 = vpop.xlane.xlu0 %800 }
  0xcd   : > { %v308_v14 = vsel %vm307_vm5, %v298_v3, %v294_v2  ;;  %v817_v15 = vmul.f32 0.00390625, %v801_v11  ;;  %v1098_v16 = vpop.xlane.xlu1 %1097 }
  0xce   : > { %v1114_v18 = vmul.f32 0.00390625, %v1098_v16  ;;  %v310_v19 = vsel %vm309_vm6, %v302_v4, %v308_v14 }
  0xcf   : > { %v821_v24 = vmul.f32 %v817_v15, %v2250_v10  ;;  %v822_v25 = vmul.f32 %v817_v15, %v2253_v12  ;;  %v312_v34 = vsel %vm311_vm7, %v306_v5, %v310_v19 }
  0xd0   : > { %v1118_v35 = vmul.f32 %v1114_v18, %v2256_v13  ;;  %v1119_v36 = vmul.f32 %v1114_v18, %v2263_v17  ;;  %1827 = vmatmul.mubr.msk.f32.vlgmr.msra.gmra.mrb[0].mxu0 %vm313_vm8, %v312_v34  ;;  %v1395_v37 = vpop.xlane.xlu0 %1394 }
  0xd1   : > { %v837_v38 = vrot.slane %v821_v24, 2  ;;  %v838_v39 = vrot.slane %v822_v25, 2  ;;  %v1411_v44 = vmul.f32 0.00390625, %v1395_v37  ;;  %v806_v45 = vpop.xlane.xlu1 %805 }
  0xd2   : > { %v1134_v46 = vrot.slane %v1118_v35, 4  ;;  %v1135_v47 = vrot.slane %v1119_v36, 4  ;;  %v818_v49 = vmul.f32 0.00390625, %v806_v45 }
  0xd3   : > { %v853_v54 = vsel %vm392_vm3, %v837_v38, 0.0  ;;  %v860_v10 = vsel %vm392_vm3, %v838_v39, 0.0  ;;  %v1415_v12 = vmul.f32 %v1411_v44, %v2270_v20  ;;  %v1416_v55 = vmul.f32 %v1411_v44, %v2273_v21 }
  0xd4   : > { %v854_v13 = vrot.slane %v853_v54, 4  ;;  %v861_v56 = vrot.slane %v860_v10, 4  ;;  %v1150_v17 = vsel %vm392_vm3, %v1134_v46, 0.0  ;;  %v1157_v57 = vsel %vm392_vm3, %v1135_v47, 0.0  ;;  %v1103_v59 = vpop.xlane.xlu0 %1102 }
  0xd5   : > { %v1151_v60 = vrot.slane %v1150_v17, 4  ;;  %v1158_v0 = vrot.slane %v1157_v57, 4  ;;  %v1431_v1 = vrot.slane %v1415_v12, 6  ;;  %v1432_v2 = vrot.slane %v1416_v55, 6  ;;  %v1400_v3 = vpop.xlane.xlu1 %1399 }
  0xd6   : > { %v2425_v4 = vadd.f32 %v854_v13, %v853_v54  ;;  %v2427_v5 = vadd.f32 %v861_v56, %v860_v10  ;;  %v823_v20 = vmul.f32 %v818_v49, %v2276_v22  ;;  %v824_v21 = vmul.f32 %v818_v49, %v2279_v23 }
  0xd7   : > { %v2431_v11 = vadd.f32 %v1151_v60, %v1150_v17  ;;  %v2433_v14 = vadd.f32 %v1158_v0, %v1157_v57  ;;  %v1447_v15 = vsel %vm392_vm3, %v1431_v1, 0.0  ;;  %v1454_v16 = vsel %vm392_vm3, %v1432_v2, 0.0 }
  0xd8   : > { %v1448_v18 = vrot.slane %v1447_v15, 4  ;;  %v1455_v19 = vrot.slane %v1454_v16, 4  ;;  %v839_v24 = vrot.slane %v823_v20, 2  ;;  %v840_v25 = vrot.slane %v824_v21, 2  ;;  %v528_v34 = vpop.xlane.xlu0 %527 }
  0xd9   : > { %v1115_v35 = vmul.f32 0.00390625, %v1103_v59  ;;  %v1412_v36 = vmul.f32 0.00390625, %v1400_v3  ;;  %v544_v37 = vmul.f32 0.00390625, %v528_v34  ;;  %v856_v22 = vrot.slane %v2425_v4, 2  ;;  %v811_v45 = vpop.xlane.xlu1 %810 }
  0xda   : > { %v2438_v38 = vadd.f32 %v1448_v18, %v1447_v15  ;;  %v2440_v23 = vadd.f32 %v1455_v19, %v1454_v16  ;;  %v867_v39 = vsel %vm392_vm3, %v839_v24, 0.0  ;;  %v874_v44 = vsel %vm392_vm3, %v840_v25, 0.0 }
  0xdb   : > { %v868_v46 = vrot.slane %v867_v39, 4  ;;  %v875_v47 = vrot.slane %v874_v44, 4  ;;  %v1120_v49 = vmul.f32 %v1115_v35, %v2290_v30  ;;  %v1121_v54 = vmul.f32 %v1115_v35, %v2293_v31 }
  0xdc   : > { %v1417_v10 = vmul.f32 %v1412_v36, %v2296_v32  ;;  %v1418_v12 = vmul.f32 %v1412_v36, %v2299_v33  ;;  %v548_v55 = vmul.f32 %v544_v37, %v2310_v40  ;;  %v549_v13 = vmul.f32 %v544_v37, %v2313_v41  ;;  %v1108_v56 = vpop.xlane.xlu0 %1107 }
  0xdd   : > { %v2450_v17 = vadd.f32 %v868_v46, %v867_v39  ;;  %v2452_v57 = vadd.f32 %v875_v47, %v874_v44  ;;  %v1136_v59 = vrot.slane %v1120_v49, 4  ;;  %v1137_v60 = vrot.slane %v1121_v54, 4  ;;  %v1405_v15 = vpop.xlane.xlu1 %1404 }
  0xde   : > { %v1433_v0 = vrot.slane %v1417_v10, 6  ;;  %v1434_v1 = vrot.slane %v1418_v12, 6  ;;  %v556_v30 = vsel %vm392_vm3, %v548_v55, 0.0  ;;  %v563_v31 = vsel %vm392_vm3, %v549_v13, 0.0 }
  0xdf   : > { %v1164_v32 = vsel %vm392_vm3, %v1136_v59, 0.0  ;;  %v1171_v33 = vsel %vm392_vm3, %v1137_v60, 0.0  ;;  %v557_v40 = vrot.slane %v556_v30, 4  ;;  %v564_v2 = vrot.slane %v563_v31, 4 }
  0xe0   : > { %v1165_v41 = vrot.slane %v1164_v32, 4  ;;  %v1172_v3 = vrot.slane %v1171_v33, 4  ;;  %v1461_v20 = vsel %vm392_vm3, %v1433_v0, 0.0  ;;  %v1468_v21 = vsel %vm392_vm3, %v1434_v1, 0.0  ;;  %v533_v16 = vpop.xlane.xlu0 %532 }
  0xe1   : > { %v1462_v18 = vrot.slane %v1461_v20, 4  ;;  %v1469_v19 = vrot.slane %v1468_v21, 4  ;;  %v2460_v24 = vadd.f32 %v557_v40, %v556_v30  ;;  %v2462_v25 = vadd.f32 %v564_v2, %v563_v31 }
  0xe2   : > { %v2464_v34 = vadd.f32 %v1165_v41, %v1164_v32  ;;  %v2466_v35 = vadd.f32 %v1172_v3, %v1171_v33  ;;  %v819_v36 = vmul.f32 0.00390625, %v811_v45  ;;  %v1116_v37 = vmul.f32 0.00390625, %v1108_v56 }
  0xe3   : > { %v2468_v39 = vadd.f32 %v1462_v18, %v1461_v20  ;;  %v2470_v44 = vadd.f32 %v1469_v19, %v1468_v21  ;;  %v1413_v46 = vmul.f32 0.00390625, %v1405_v15  ;;  %v545_v47 = vmul.f32 0.00390625, %v533_v16  ;;  %v816_v20 = vpop.xlane.xlu1 %815 }
  0xe4   : > { %v825_v49 = vmul.f32 %v819_v36, %v2316_v42  ;;  %v826_v54 = vmul.f32 %v819_v36, %v2319_v43  ;;  %v1122_v10 = vmul.f32 %v1116_v37, %v2330_v50  ;;  %v1123_v12 = vmul.f32 %v1116_v37, %v2333_v51 }
  0xe5   : > { %v1419_v55 = vmul.f32 %v1413_v46, %v2336_v52  ;;  %v1420_v13 = vmul.f32 %v1413_v46, %v2339_v53  ;;  %v550_v45 = vmul.f32 %v545_v47, %v2346_v58  ;;  %v551_v56 = vmul.f32 %v545_v47, %v2353_v61  ;;  %v1113_v47 = vpop.xlane.xlu0 %1112 }
  0xe6   : > { %v841_v59 = vrot.slane %v825_v49, 2  ;;  %v842_v60 = vrot.slane %v826_v54, 2  ;;  %v1138_v0 = vrot.slane %v1122_v10, 4  ;;  %v1139_v1 = vrot.slane %v1123_v12, 4 }
  0xe7   : > { %v1435_v30 = vrot.slane %v1419_v55, 6  ;;  %v1436_v42 = vrot.slane %v1420_v13, 6  ;;  %v570_v43 = vsel %vm392_vm3, %v550_v45, 0.0  ;;  %v577_v50 = vsel %vm392_vm3, %v551_v56, 0.0 }
  0xe8   : > { %v881_v51 = vsel %vm392_vm3, %v841_v59, 0.0  ;;  %v888_v52 = vsel %vm392_vm3, %v842_v60, 0.0  ;;  %v1178_v53 = vsel %vm392_vm3, %v1138_v0, 0.0  ;;  %v1185_v58 = vsel %vm392_vm3, %v1139_v1, 0.0 }
  0xe9   : > { %v882_v31 = vrot.slane %v881_v51, 4  ;;  %v889_v61 = vrot.slane %v888_v52, 4  ;;  %v1179_v32 = vrot.slane %v1178_v53, 4  ;;  %v1186_v33 = vrot.slane %v1185_v58, 4 }
  0xea   : > { %v1475_v40 = vsel %vm392_vm3, %v1435_v30, 0.0  ;;  %v1482_v2 = vsel %vm392_vm3, %v1436_v42, 0.0  ;;  %v571_v41 = vrot.slane %v570_v43, 4  ;;  %v578_v3 = vrot.slane %v577_v50, 4 }
  0xeb   : > { %v2488_v21 = vadd.f32 %v882_v31, %v881_v51  ;;  %v2490_v15 = vadd.f32 %v889_v61, %v888_v52  ;;  %v2492_v16 = vadd.f32 %v1179_v32, %v1178_v53  ;;  %v2494_v18 = vadd.f32 %v1186_v33, %v1185_v58 }
  0xec   : > { %v1476_v19 = vrot.slane %v1475_v40, 4  ;;  %v1483_v36 = vrot.slane %v1482_v2, 4  ;;  %v2496_v37 = vadd.f32 %v571_v41, %v570_v43  ;;  %v2498_v46 = vadd.f32 %v578_v3, %v577_v50  ;;  %v1410_v43 = vpop.xlane.xlu1 %1409 }
  0xed   : > { %v857_v49 = vadd.f32 %v856_v22, %v2425_v4  ;;  %v863_v54 = vrot.slane %v2427_v5, 2  ;;  %v820_v10 = vmul.f32 0.00390625, %v816_v20  ;;  %v1117_v12 = vmul.f32 0.00390625, %v1113_v47 }
  0xee   : > { %v2504_v55 = vadd.f32 %v1476_v19, %v1475_v40  ;;  %v2506_v13 = vadd.f32 %v1483_v36, %v1482_v2  ;;  %v1450_v45 = vrot.slane %v2438_v38, 2  ;;  %v1457_v56 = vrot.slane %v2440_v23, 2  ;;  %v538_v40 = vpop.xlane.xlu0 %537 }
  0xef   : > { %v858_v59 = vrot.slane %v857_v49, 1  ;;  %v864_v60 = vadd.f32 %v863_v54, %v2427_v5  ;;  %v827_v0 = vmul.f32 %v820_v10, %v2356_v62  ;;  %v828_v1 = vmul.f32 %v820_v10, %v2359_v63 }
  0xf0   : > { %v1124_v4 = vmul.f32 %v1117_v12, %v2370_v6  ;;  %v1125_v22 = vmul.f32 %v1117_v12, %v2373_v7  ;;  %v1451_v30 = vadd.f32 %v1450_v45, %v2438_v38  ;;  %v1458_v42 = vadd.f32 %v1457_v56, %v2440_v23  ;;  %v543_v54 = vpop.xlane.xlu1 %542 }
  0xf1   : > { %v2517_v50 = vadd.f32 %v858_v59, %v857_v49  ;;  %v865_v51 = vrot.slane %v864_v60, 1  ;;  %v843_v52 = vrot.slane %v827_v0, 2  ;;  %v844_v53 = vrot.slane %v828_v1, 2 }
  0xf2   : > { %v1140_v58 = vrot.slane %v1124_v4, 4  ;;  %v1141_v5 = vrot.slane %v1125_v22, 4  ;;  %v1452_v31 = vrot.slane %v1451_v30, 1  ;;  %v1459_v62 = vrot.slane %v1458_v42, 1 }
  0xf3   : > { %v2519_v61 = vadd.f32 %v865_v51, %v864_v60  ;;  %v895_v63 = vsel %vm392_vm3, %v843_v52, 0.0  ;;  %v902_v6 = vsel %vm392_vm3, %v844_v53, 0.0  ;;  %v1414_v7 = vmul.f32 0.00390625, %v1410_v43 }
  0xf4   : > { %v896_v38 = vrot.slane %v895_v63, 4  ;;  %v903_v32 = vrot.slane %v902_v6, 4  ;;  %v1192_v23 = vsel %vm392_vm3, %v1140_v58, 0.0  ;;  %v1199_v33 = vsel %vm392_vm3, %v1141_v5, 0.0 }
  0xf5   : > { %v909_v2 = vadd.f32 %v2519_v61, %v2517_v50  ;;  %v1193_v41 = vrot.slane %v1192_v23, 4  ;;  %v1200_v3 = vrot.slane %v1199_v33, 4  ;;  %v2527_v20 = vadd.f32 %v1452_v31, %v1451_v30 }
  0xf6   : > { %v2529_v19 = vadd.f32 %v896_v38, %v895_v63  ;;  %v2531_v36 = vadd.f32 %v903_v32, %v902_v6  ;;  %v2533_v47 = vadd.f32 %v1459_v62, %v1458_v42  ;;  %v1421_v49 = vmul.f32 %v1414_v7, %v2376_v8 }
  0xf7   : > { %910 = vadd.xlane.f32.xlu1 %v909_v2  ;;  %v2536_v10 = vadd.f32 %v1193_v41, %v1192_v23  ;;  %v2538_v12 = vadd.f32 %v1200_v3, %v1199_v33  ;;  %v1422_v45 = vmul.f32 %v1414_v7, %v2379_v9  ;;  %v546_v56 = vmul.f32 0.00390625, %v538_v40 }
  0xf8   : > { %v1503_v59 = vadd.f32 %v2533_v47, %v2527_v20  ;;  %v1437_v60 = vrot.slane %v1421_v49, 6  ;;  %v870_v0 = vrot.slane %v2450_v17, 2  ;;  %v877_v1 = vrot.slane %v2452_v57, 2 }
  0xf9   : > { %v1438_v4 = vrot.slane %v1422_v45, 6  ;;  %v552_v8 = vmul.f32 %v546_v56, %v2393_v26  ;;  %v553_v22 = vmul.f32 %v546_v56, %v2396_v27  ;;  %v547_v30 = vmul.f32 0.00390625, %v543_v54 }
  0xfa   : > { %v1489_v42 = vsel %vm392_vm3, %v1437_v60, 0.0  ;;  %v871_v43 = vadd.f32 %v870_v0, %v2450_v17  ;;  %v878_v9 = vadd.f32 %v877_v1, %v2452_v57  ;;  %v559_v51 = vrot.slane %v2460_v24, 2 }
  0xfb   : > { %1504 = vadd.xlane.f32.xlu1 %v1503_v59  ;;  %v1490_v52 = vrot.slane %v1489_v42, 4  ;;  %v1496_v53 = vsel %vm392_vm3, %v1438_v4, 0.0  ;;  %v584_v58 = vsel %vm392_vm3, %v552_v8, 0.0  ;;  %v591_v5 = vsel %vm392_vm3, %v553_v22, 0.0 }
  0xfc   : > { %v1497_v26 = vrot.slane %v1496_v53, 4  ;;  %v585_v31 = vrot.slane %v584_v58, 4  ;;  %v592_v27 = vrot.slane %v591_v5, 4  ;;  %v872_v62 = vrot.slane %v871_v43, 1 }
  0xfd   : > { %v2554_v63 = vadd.f32 %v1490_v52, %v1489_v42  ;;  %v879_v6 = vrot.slane %v878_v9, 1  ;;  %v554_v17 = vmul.f32 %v547_v30, %v2399_v28  ;;  %v555_v57 = vmul.f32 %v547_v30, %v2402_v29 }
  0xfe   : > { %v2558_v7 = vadd.f32 %v1497_v26, %v1496_v53  ;;  %v2560_v38 = vadd.f32 %v585_v31, %v584_v58  ;;  %v2562_v32 = vadd.f32 %v592_v27, %v591_v5  ;;  %v2564_v23 = vadd.f32 %v872_v62, %v871_v43 }
  0xff   : > { %v2566_v33 = vadd.f32 %v879_v6, %v878_v9  ;;  %v598_v40 = vsel %vm392_vm3, %v554_v17, 0.0  ;;  %v605_v2 = vsel %vm392_vm3, %v555_v57, 0.0  ;;  %v560_v41 = vadd.f32 %v559_v51, %v2460_v24 }
 0x100   : > { %v599_v3 = vrot.slane %v598_v40, 4  ;;  %v606_v28 = vrot.slane %v605_v2, 4  ;;  %v566_v29 = vrot.slane %v2462_v25, 2  ;;  %v1464_v49 = vrot.slane %v2468_v39, 2 }
 0x101   : > { %v912_v54 = vadd.f32 %v2566_v33, %v2564_v23  ;;  %v561_v45 = vrot.slane %v560_v41, 1  ;;  %v1471_v56 = vrot.slane %v2470_v44, 2  ;;  %v884_v59 = vrot.slane %v2488_v21, 2 }
 0x102   : > { %v2577_v60 = vadd.f32 %v599_v3, %v598_v40  ;;  %v2579_v0 = vadd.f32 %v606_v28, %v605_v2  ;;  %v567_v24 = vadd.f32 %v566_v29, %v2462_v25  ;;  %v1465_v1 = vadd.f32 %v1464_v49, %v2468_v39 }
 0x103   : > { %913 = vadd.xlane.f32.xlu1 %v912_v54  ;;  %v2583_v4 = vadd.f32 %v561_v45, %v560_v41  ;;  %v1472_v8 = vadd.f32 %v1471_v56, %v2470_v44  ;;  %v885_v22 = vadd.f32 %v884_v59, %v2488_v21  ;;  %v891_v30 = vrot.slane %v2490_v15, 2 }
 0x104   : > { %v568_v42 = vrot.slane %v567_v24, 1  ;;  %v1466_v43 = vrot.slane %v1465_v1, 1  ;;  %v573_v9 = vrot.slane %v2496_v37, 2  ;;  %v580_v51 = vrot.slane %v2498_v46, 2 }
 0x105   : > { %v1473_v52 = vrot.slane %v1472_v8, 1  ;;  %v886_v53 = vrot.slane %v885_v22, 1  ;;  %v892_v25 = vadd.f32 %v891_v30, %v2490_v15  ;;  %v1478_v39 = vrot.slane %v2504_v55, 2 }
 0x106   : > { %v2592_v58 = vadd.f32 %v568_v42, %v567_v24  ;;  %v2594_v5 = vadd.f32 %v1466_v43, %v1465_v1  ;;  %v574_v44 = vadd.f32 %v573_v9, %v2496_v37  ;;  %v581_v21 = vadd.f32 %v580_v51, %v2498_v46 }
 0x107   : > { %v2598_v26 = vadd.f32 %v1473_v52, %v1472_v8  ;;  %v2600_v31 = vadd.f32 %v886_v53, %v885_v22  ;;  %v893_v27 = vrot.slane %v892_v25, 1  ;;  %v1479_v62 = vadd.f32 %v1478_v39, %v2504_v55 }
 0x108   : > { %v612_v15 = vadd.f32 %v2592_v58, %v2583_v4  ;;  %v575_v6 = vrot.slane %v574_v44, 1  ;;  %v582_v17 = vrot.slane %v581_v21, 1  ;;  %v1485_v57 = vrot.slane %v2506_v13, 2 }
 0x109   : > { %v1506_v40 = vadd.f32 %v2598_v26, %v2594_v5  ;;  %v2608_v37 = vadd.f32 %v893_v27, %v892_v25  ;;  %v1480_v46 = vrot.slane %v1479_v62, 1  ;;  %v898_v2 = vrot.slane %v2529_v19, 2 }
 0x10a   : > { %613 = vadd.xlane.f32.xlu0 %v612_v15  ;;  %v2611_v41 = vadd.f32 %v575_v6, %v574_v44  ;;  %v2613_v3 = vadd.f32 %v582_v17, %v581_v21  ;;  %v1486_v55 = vadd.f32 %v1485_v57, %v2506_v13  ;;  %v905_v28 = vrot.slane %v2531_v36, 2 }
 0x10b   : > { %1507 = vadd.xlane.f32.xlu1 %v1506_v40  ;;  %v915_v29 = vadd.f32 %v2608_v37, %v2600_v31  ;;  %v2619_v49 = vadd.f32 %v1480_v46, %v1479_v62  ;;  %v899_v54 = vadd.f32 %v898_v2, %v2529_v19  ;;  %v587_v45 = vrot.slane %v2560_v38, 2 }
 0x10c   : > { %v615_v56 = vadd.f32 %v2613_v3, %v2611_v41  ;;  %v1487_v59 = vrot.slane %v1486_v55, 1  ;;  %v906_v24 = vadd.f32 %v905_v28, %v2531_v36  ;;  %v594_v13 = vrot.slane %v2562_v32, 2 }
 0x10d   : > { %v900_v1 = vrot.slane %v899_v54, 1  ;;  %v588_v8 = vadd.f32 %v587_v45, %v2560_v38  ;;  %v1492_v22 = vrot.slane %v2554_v63, 2  ;;  %v1499_v30 = vrot.slane %v2558_v7, 2 }
 0x10e   : > { %616 = vadd.xlane.f32.xlu0 %v615_v56  ;;  %v2630_v42 = vadd.f32 %v1487_v59, %v1486_v55  ;;  %v907_v19 = vrot.slane %v906_v24, 1  ;;  %v595_v43 = vadd.f32 %v594_v13, %v2562_v32  ;;  %v601_v9 = vrot.slane %v2577_v60, 2 }
 0x10f   : > { %916 = vadd.xlane.f32.xlu1 %v915_v29  ;;  %v2634_v51 = vadd.f32 %v900_v1, %v899_v54  ;;  %v589_v36 = vrot.slane %v588_v8, 1  ;;  %v1493_v52 = vadd.f32 %v1492_v22, %v2554_v63  ;;  %v1500_v38 = vadd.f32 %v1499_v30, %v2558_v7 }
 0x110   : > { %v1509_v53 = vadd.f32 %v2630_v42, %v2619_v49  ;;  %v2640_v25 = vadd.f32 %v907_v19, %v906_v24  ;;  %v596_v39 = vrot.slane %v595_v43, 1  ;;  %v602_v44 = vadd.f32 %v601_v9, %v2577_v60 }
 0x111   : > { %v2643_v21 = vadd.f32 %v589_v36, %v588_v8  ;;  %v1494_v32 = vrot.slane %v1493_v52, 1  ;;  %v1501_v27 = vrot.slane %v1500_v38, 1  ;;  %v608_v62 = vrot.slane %v2579_v0, 2 }
 0x112   : > { %v918_v15 = vadd.f32 %v2640_v25, %v2634_v51  ;;  %v2648_v63 = vadd.f32 %v596_v39, %v595_v43  ;;  %v603_v7 = vrot.slane %v602_v44, 1  ;;  %v1153_v6 = vrot.slane %v2431_v11, 2 }
 0x113   : > { %1510 = vadd.xlane.f32.xlu1 %v1509_v53  ;;  %v2651_v17 = vadd.f32 %v1494_v32, %v1493_v52  ;;  %v2653_v57 = vadd.f32 %v1501_v27, %v1500_v38  ;;  %v609_v60 = vadd.f32 %v608_v62, %v2579_v0  ;;  %v1160_v40 = vrot.slane %v2433_v14, 2 }
 0x114   : > { %v618_v46 = vadd.f32 %v2648_v63, %v2643_v21  ;;  %v2659_v2 = vadd.f32 %v603_v7, %v602_v44  ;;  %v1154_v55 = vadd.f32 %v1153_v6, %v2431_v11  ;;  %v1167_v28 = vrot.slane %v2464_v34, 2 }
 0x115   : > { %v1512_v29 = vadd.f32 %v2653_v57, %v2651_v17  ;;  %v610_v54 = vrot.slane %v609_v60, 1  ;;  %v1161_v45 = vadd.f32 %v1160_v40, %v2433_v14  ;;  %v1174_v56 = vrot.slane %v2466_v35, 2  ;;  %v387_v40 = vld [vmem:[%s3210_s2] sm:$0x3] }
 0x116   : > { %619 = vadd.xlane.f32.xlu0 %v618_v46  ;;  %v1155_v0 = vrot.slane %v1154_v55, 1  ;;  %v1168_v59 = vadd.f32 %v1167_v28, %v2464_v34  ;;  %v1181_v24 = vrot.slane %v2492_v16, 2  ;;  %v1188_v13 = vrot.slane %v2494_v18, 2  ;;  %1830 = vmatpush3.msk.msra.mxu1 %vm392_vm3, %v387_v40 }
 0x117   : > { %919 = vadd.xlane.f32.xlu1 %v918_v15  ;;  %v2670_v11 = vadd.f32 %v610_v54, %v609_v60  ;;  %v1162_v1 = vrot.slane %v1161_v45, 1  ;;  %v1175_v8 = vadd.f32 %v1174_v56, %v2466_v35  ;;  %v1195_v22 = vrot.slane %v2536_v10, 2 }
 0x118   : > { %v2674_v30 = vadd.f32 %v1155_v0, %v1154_v55  ;;  %v1169_v14 = vrot.slane %v1168_v59, 1  ;;  %v1182_v19 = vadd.f32 %v1181_v24, %v2492_v16  ;;  %v1189_v43 = vadd.f32 %v1188_v13, %v2494_v18 }
 0x119   : > { %v621_v34 = vadd.f32 %v2670_v11, %v2659_v2  ;;  %v2680_v9 = vadd.f32 %v1162_v1, %v1161_v45  ;;  %v1176_v36 = vrot.slane %v1175_v8, 1  ;;  %v1196_v38 = vadd.f32 %v1195_v22, %v2536_v10 }
 0x11a   : > { %v2682_v52 = vadd.f32 %v1169_v14, %v1168_v59  ;;  %v1202_v35 = vrot.slane %v2538_v12, 2  ;;  %v1183_v18 = vrot.slane %v1182_v19, 1  ;;  %v1190_v39 = vrot.slane %v1189_v43, 1 }
 0x11b   : > { %1513 = vadd.xlane.f32.xlu1 %v1512_v29  ;;  %622 = vadd.xlane.f32.xlu0 %v621_v34  ;;  %v1206_v53 = vadd.f32 %v2680_v9, %v2674_v30  ;;  %v2688_v16 = vadd.f32 %v1176_v36, %v1175_v8  ;;  %v1197_v32 = vrot.slane %v1196_v38, 1 }
 0x11c   : > { %v1203_v44 = vadd.f32 %v1202_v35, %v2538_v12  ;;  %v2693_v62 = vadd.f32 %v1183_v18, %v1182_v19  ;;  %v2695_v10 = vadd.f32 %v1190_v39, %v1189_v43 }
 0x11d   : > { %v1209_v27 = vadd.f32 %v2688_v16, %v2682_v52  ;;  %v2699_v6 = vadd.f32 %v1197_v32, %v1196_v38 }
 0x11e   : > { %v1204_v15 = vrot.slane %v1203_v44, 1  ;;  %v1212_v7 = vadd.f32 %v2695_v10, %v2693_v62 }
 0x11f   : > { %1207 = vadd.xlane.f32.xlu0 %v1206_v53 }
 0x120   : > { %v2701_v60 = vadd.f32 %v1204_v15, %v1203_v44 }
 0x122   : > { %v1215_v12 = vadd.f32 %v2701_v60, %v2699_v6 }
 0x123   : > { %1210 = vadd.xlane.f32.xlu0 %v1209_v27 }
 0x127   : > { %1213 = vadd.xlane.f32.xlu0 %v1212_v7 }
 0x12b   : > { %1216 = vadd.xlane.f32.xlu0 %v1215_v12 }
 0x184   : > { %v911_v46 = vpop.xlane.xlu1 %910 }
 0x185   : > { %v921_v55 = vmul.f32 0.00390625, %v911_v46 }
 0x187   : > { %v2710_v28 = vsub.f32 %v2517_v50, %v921_v55  ;;  %v2713_v29 = vsub.f32 %v2519_v61, %v921_v55 }
 0x188   : > { %v1505_v54 = vpop.xlane.xlu1 %1504 }
 0x189   : > { %v1515_v45 = vmul.f32 0.00390625, %v1505_v54  ;;  %v933_v56 = vmul.f32 %v2710_v28, %v2710_v28  ;;  %v934_v0 = vmul.f32 %v2713_v29, %v2713_v29 }
 0x18b   : > { %v2720_v59 = vsub.f32 %v2527_v20, %v1515_v45  ;;  %v2723_v24 = vsub.f32 %v2533_v47, %v1515_v45  ;;  %v941_v13 = vadd.f32 %v934_v0, %v933_v56 }
 0x18d   : > { %942 = vadd.xlane.f32.xlu1 %v941_v13  ;;  %v1527_v50 = vmul.f32 %v2720_v59, %v2720_v59  ;;  %v1528_v61 = vmul.f32 %v2723_v24, %v2723_v24 }
 0x18f   : > { %v1535_v1 = vadd.f32 %v1528_v61, %v1527_v50 }
 0x190   : > { %v914_v8 = vpop.xlane.xlu1 %913 }
 0x191   : > { %v922_v22 = vmul.f32 0.00390625, %v914_v8  ;;  %1536 = vadd.xlane.f32.xlu1 %v1535_v1 }
 0x193   : > { %v2730_v14 = vsub.f32 %v2564_v23, %v922_v22  ;;  %v2733_v20 = vsub.f32 %v2566_v33, %v922_v22 }
 0x195   : > { %v935_v47 = vmul.f32 %v2730_v14, %v2730_v14  ;;  %v936_v19 = vmul.f32 %v2733_v20, %v2733_v20 }
 0x197   : > { %v614_v43 = vpop.xlane.xlu0 %613  ;;  %v944_v34 = vadd.f32 %v936_v19, %v935_v47 }
 0x198   : > { %v624_v36 = vmul.f32 0.00390625, %v614_v43  ;;  %v1508_v38 = vpop.xlane.xlu1 %1507 }
 0x199   : > { %v1516_v35 = vmul.f32 0.00390625, %v1508_v38  ;;  %945 = vadd.xlane.f32.xlu1 %v944_v34 }
 0x19a   : > { %v2740_v53 = vsub.f32 %v2583_v4, %v624_v36  ;;  %v2743_v23 = vsub.f32 %v2592_v58, %v624_v36 }
 0x19b   : > { %v2746_v33 = vsub.f32 %v2594_v5, %v1516_v35  ;;  %v2749_v18 = vsub.f32 %v2598_v26, %v1516_v35  ;;  %v617_v39 = vpop.xlane.xlu0 %616 }
 0x19c   : > { %v917_v44 = vpop.xlane.xlu1 %916  ;;  %v625_v32 = vmul.f32 0.00390625, %v617_v39  ;;  %v636_v27 = vmul.f32 %v2740_v53, %v2740_v53  ;;  %v637_v15 = vmul.f32 %v2743_v23, %v2743_v23 }
 0x19d   : > { %v923_v4 = vmul.f32 0.00390625, %v917_v44  ;;  %v1529_v58 = vmul.f32 %v2746_v33, %v2746_v33  ;;  %v1530_v5 = vmul.f32 %v2749_v18, %v2749_v18 }
 0x19e   : > { %v2760_v7 = vsub.f32 %v2611_v41, %v625_v32  ;;  %v2763_v26 = vsub.f32 %v2613_v3, %v625_v32  ;;  %v644_v12 = vadd.f32 %v637_v15, %v636_v27 }
 0x19f   : > { %v2766_v40 = vsub.f32 %v2600_v31, %v923_v4  ;;  %v2769_v46 = vsub.f32 %v2608_v37, %v923_v4  ;;  %v1538_v55 = vadd.f32 %v1530_v5, %v1529_v58 }
 0x1a0   : > { %645 = vadd.xlane.f32.xlu0 %v644_v12  ;;  %v1511_v54 = vpop.xlane.xlu1 %1510  ;;  %v638_v45 = vmul.f32 %v2760_v7, %v2760_v7  ;;  %v639_v41 = vmul.f32 %v2763_v26, %v2763_v26 }
 0x1a1   : > { %v1517_v56 = vmul.f32 0.00390625, %v1511_v54  ;;  %1539 = vadd.xlane.f32.xlu1 %v1538_v55  ;;  %v937_v3 = vmul.f32 %v2766_v40, %v2766_v40  ;;  %v938_v31 = vmul.f32 %v2769_v46, %v2769_v46 }
 0x1a2   : > { %v647_v0 = vadd.f32 %v639_v41, %v638_v45 }
 0x1a3   : > { %v2780_v37 = vsub.f32 %v2619_v49, %v1517_v56  ;;  %v2783_v13 = vsub.f32 %v2630_v42, %v1517_v56  ;;  %v947_v50 = vadd.f32 %v938_v31, %v937_v3  ;;  %v620_v61 = vpop.xlane.xlu0 %619  ;;  %v382_v1 = vpop.f32.mrb[0].mxu0 }
 0x1a4   : > { %v920_v8 = vpop.xlane.xlu1 %919  ;;  %v626_v22 = vmul.f32 0.00390625, %v620_v61  ;;  %648 = vadd.xlane.f32.xlu0 %v647_v0  ;;  %v386_v47 = vmax.f32 %v382_v1, 0.0  ;;  %v1828_v19 = vpop.f32.mrb[1].mxu0 }
 0x1a5   : > { %v924_v43 = vmul.f32 0.00390625, %v920_v8  ;;  %948 = vadd.xlane.f32.xlu1 %v947_v50  ;;  %v1531_v34 = vmul.f32 %v2780_v37, %v2780_v37  ;;  %v1532_v49 = vmul.f32 %v2783_v13, %v2783_v13 }
 0x1a6   : > { %v2790_v42 = vsub.f32 %v2643_v21, %v626_v22  ;;  %v2793_v36 = vsub.f32 %v2648_v63, %v626_v22  ;;  %1832 = vmatmul.mubr.msk.f32.vlgmr.msra.gmra.mrb[0].mxu1 %vm388_vm9, %v386_v47 }
 0x1a7   : > { %v2796_v38 = vsub.f32 %v2634_v51, %v924_v43  ;;  %v2799_v35 = vsub.f32 %v2640_v25, %v924_v43  ;;  %v1541_v39 = vadd.f32 %v1532_v49, %v1531_v34 }
 0x1a8   : > { %v1514_v44 = vpop.xlane.xlu1 %1513  ;;  %v623_v32 = vpop.xlane.xlu0 %622  ;;  %v640_v27 = vmul.f32 %v2790_v42, %v2790_v42  ;;  %v641_v21 = vmul.f32 %v2793_v36, %v2793_v36 }
 0x1a9   : > { %v1518_v15 = vmul.f32 0.00390625, %v1514_v44  ;;  %1542 = vadd.xlane.f32.xlu1 %v1541_v39  ;;  %v627_v63 = vmul.f32 0.00390625, %v623_v32  ;;  %v939_v4 = vmul.f32 %v2796_v38, %v2796_v38  ;;  %v940_v51 = vmul.f32 %v2799_v35, %v2799_v35 }
 0x1aa   : > { %v650_v25 = vadd.f32 %v641_v21, %v640_v27 }
 0x1ab   : > { %v2810_v58 = vsub.f32 %v2651_v17, %v1518_v15  ;;  %v2813_v5 = vsub.f32 %v2653_v57, %v1518_v15  ;;  %v2816_v12 = vsub.f32 %v2659_v2, %v627_v63  ;;  %v2819_v55 = vsub.f32 %v2670_v11, %v627_v63 }
 0x1ac   : > { %v950_v54 = vadd.f32 %v940_v51, %v939_v4  ;;  %v1208_v45 = vpop.xlane.xlu0 %1207  ;;  %651 = vadd.xlane.f32.xlu0 %v650_v25 }
 0x1ad   : > { %v1218_v41 = vmul.f32 0.00390625, %v1208_v45  ;;  %v1533_v56 = vmul.f32 %v2810_v58, %v2810_v58  ;;  %v1534_v17 = vmul.f32 %v2813_v5, %v2813_v5  ;;  %v642_v57 = vmul.f32 %v2816_v12, %v2816_v12 }
 0x1ae   : > { %951 = vadd.xlane.f32.xlu1 %v950_v54  ;;  %v643_v2 = vmul.f32 %v2819_v55, %v2819_v55 }
 0x1af   : > { %v2830_v11 = vsub.f32 %v2674_v30, %v1218_v41  ;;  %v2833_v3 = vsub.f32 %v2680_v9, %v1218_v41  ;;  %v1544_v31 = vadd.f32 %v1534_v17, %v1533_v56 }
 0x1b0   : > { %v1211_v0 = vpop.xlane.xlu0 %1210  ;;  %v653_v50 = vadd.f32 %v643_v2, %v642_v57 }
 0x1b1   : > { %v1219_v61 = vmul.f32 0.00390625, %v1211_v0  ;;  %v1230_v1 = vmul.f32 %v2830_v11, %v2830_v11  ;;  %v1231_v8 = vmul.f32 %v2833_v3, %v2833_v3 }
 0x1b2   : > { %1545 = vadd.xlane.f32.xlu1 %v1544_v31  ;;  %654 = vadd.xlane.f32.xlu0 %v653_v50 }
 0x1b3   : > { %v2840_v22 = vsub.f32 %v2682_v52, %v1219_v61  ;;  %v2843_v30 = vsub.f32 %v2688_v16, %v1219_v61  ;;  %v1238_v9 = vadd.f32 %v1231_v8, %v1230_v1 }
 0x1b4   : > { %v1214_v47 = vpop.xlane.xlu0 %1213 }
 0x1b5   : > { %v1220_v19 = vmul.f32 0.00390625, %v1214_v47  ;;  %v1232_v43 = vmul.f32 %v2840_v22, %v2840_v22  ;;  %v1233_v34 = vmul.f32 %v2843_v30, %v2843_v30 }
 0x1b6   : > { %1239 = vadd.xlane.f32.xlu0 %v1238_v9 }
 0x1b7   : > { %v2850_v49 = vsub.f32 %v2693_v62, %v1220_v19  ;;  %v2853_v39 = vsub.f32 %v2695_v10, %v1220_v19  ;;  %v1241_v52 = vadd.f32 %v1233_v34, %v1232_v43 }
 0x1b8   : > { %v1217_v44 = vpop.xlane.xlu0 %1216 }
 0x1b9   : > { %v1221_v16 = vmul.f32 0.00390625, %v1217_v44  ;;  %v1234_v32 = vmul.f32 %v2850_v49, %v2850_v49  ;;  %v1235_v27 = vmul.f32 %v2853_v39, %v2853_v39 }
 0x1ba   : > { %1242 = vadd.xlane.f32.xlu0 %v1241_v52 }
 0x1bb   : > { %v2860_v21 = vsub.f32 %v2699_v6, %v1221_v16  ;;  %v2863_v15 = vsub.f32 %v2701_v60, %v1221_v16  ;;  %v1244_v62 = vadd.f32 %v1235_v27, %v1234_v32 }
 0x1bd   : > { %v1236_v10 = vmul.f32 %v2860_v21, %v2860_v21  ;;  %v1237_v63 = vmul.f32 %v2863_v15, %v2863_v15 }
 0x1be   : > { %1245 = vadd.xlane.f32.xlu0 %v1244_v62  ;;  %v2879_v62 = vstv %s1786_s17 }
 0x1bf   : > { %v1247_v4 = vadd.f32 %v1237_v63, %v1236_v10  ;;  %v2881_v10 = vstv %s1787_s19 }
 0x1c2   : > { %1248 = vadd.xlane.f32.xlu0 %v1247_v4  ;;  %v2884_v4 = vstv %s1806_s20 }
 0x21a   : > { %v943_v51 = vpop.xlane.xlu1 %942 }
 0x21b   : > { %v953_v25 = vmul.f32 0.003921569, %v943_v51 }
 0x21d   : > { %1865 = vrsqrt.f32 %v953_v25  ;;  %vm959_vm10 = vcmp.eq.f32.partialorder %v953_v25, inf  ;;  %v962_v17 = vand.u32 2147483648, %v953_v25  ;;  %vm961_vm11 = vcmp.eq.f32.partialorder %v953_v25, 0.0 }
 0x21e   : > { %v1537_v54 = vpop.xlane.xlu1 %1536 }
 0x21f   : > { %v1547_v45 = vmul.f32 0.003921569, %v1537_v54 }
 0x221   : > { %1867 = vrsqrt.f32 %v1547_v45  ;;  %vm1553_vm12 = vcmp.eq.f32.partialorder %v1547_v45, inf  ;;  %v1556_v61 = vand.u32 2147483648, %v1547_v45  ;;  %vm1555_vm13 = vcmp.eq.f32.partialorder %v1547_v45, 0.0 }
 0x226   : > { %v946_v6 = vpop.xlane.xlu1 %945 }
 0x227   : > { %v1866_v41 = vpop.eup %1865  ;;  %v954_v60 = vmul.f32 0.003921569, %v946_v6 }
 0x228   : > { %v958_v56 = vmul.f32 %v1866_v41, %v953_v25 }
 0x229   : > { %1869 = vrsqrt.f32 %v954_v60  ;;  %vm966_vm14 = vcmp.eq.f32.partialorder %v954_v60, inf  ;;  %v969_v51 = vand.u32 2147483648, %v954_v60  ;;  %vm968_vm15 = vcmp.eq.f32.partialorder %v954_v60, 0.0 }
 0x22a   : > { %v960_v57 = vsel %vm959_vm10, %v953_v25, %v958_v56  ;;  %v2887_v25 = vstv %s1807_s21 }
 0x22b   : > { %v1868_v2 = vpop.eup %1867  ;;  %v963_v31 = vsel %vm961_vm11, %v962_v17, %v960_v57 }
 0x22c   : > { %v985_v0 = vadd.f32 1e-05, %v963_v31  ;;  %v1552_v50 = vmul.f32 %v1868_v2, %v1547_v45 }
 0x22d   : > { %v646_v1 = vpop.xlane.xlu0 %645 }
 0x22e   : > { %1871 = vrcp.f32 %v985_v0  ;;  %v1554_v8 = vsel %vm1553_vm12, %v1547_v45, %v1552_v50  ;;  %v2869_v9 = vmul.f32 0.003921569, %v646_v1  ;;  %v1540_v47 = vpop.xlane.xlu1 %1539 }
 0x22f   : > { %v1557_v19 = vsel %vm1555_vm13, %v1556_v61, %v1554_v8  ;;  %v2871_v43 = vmul.f32 0.003921569, %v1540_v47 }
 0x230   : > { %v1579_v34 = vadd.f32 1e-05, %v1557_v19  ;;  %1873 = vrsqrt.f32 %v2869_v9  ;;  %vm662_vm0 = vcmp.eq.f32.partialorder %v2869_v9, inf  ;;  %vm664_vm1 = vcmp.eq.f32.partialorder %v2869_v9, 0.0 }
 0x231   : > { %1875 = vrsqrt.f32 %v2871_v43  ;;  %v649_v52 = vpop.xlane.xlu0 %648  ;;  %v665_v41 = vand.u32 2147483648, %v2869_v9  ;;  %vm1560_vm2 = vcmp.eq.f32.partialorder %v2871_v43, inf  ;;  %vm1562_vm3 = vcmp.eq.f32.partialorder %v2871_v43, 0.0 }
 0x232   : > { %1877 = vrcp.f32 %v1579_v34  ;;  %v949_v44 = vpop.xlane.xlu1 %948  ;;  %v2875_v16 = vmul.f32 0.003921569, %v649_v52  ;;  %v1563_v2 = vand.u32 2147483648, %v2871_v43 }
 0x233   : > { %v1870_v32 = vpop.eup %1869  ;;  %v2877_v27 = vmul.f32 0.003921569, %v949_v44 }
 0x234   : > { %v965_v63 = vmul.f32 %v1870_v32, %v954_v60  ;;  %1879 = vrsqrt.f32 %v2875_v16  ;;  %vm669_vm4 = vcmp.eq.f32.partialorder %v2875_v16, inf  ;;  %vm671_vm7 = vcmp.eq.f32.partialorder %v2875_v16, 0.0 }
 0x235   : > { %1881 = vrsqrt.f32 %v2877_v27  ;;  %vm973_vm5 = vcmp.eq.f32.partialorder %v2877_v27, inf  ;;  %vm975_vm6 = vcmp.eq.f32.partialorder %v2877_v27, 0.0  ;;  %v976_v47 = vand.u32 2147483648, %v2877_v27 }
 0x236   : > { %v967_v54 = vsel %vm966_vm14, %v954_v60, %v965_v63  ;;  %v1543_v45 = vpop.xlane.xlu1 %1542  ;;  %v672_v44 = vand.u32 2147483648, %v2875_v16 }
 0x237   : > { %v970_v6 = vsel %vm968_vm15, %v969_v51, %v967_v54  ;;  %v2892_v56 = vmul.f32 0.003921569, %v1543_v45 }
 0x238   : > { %v1872_v17 = vpop.eup %1871  ;;  %v986_v57 = vadd.f32 1e-05, %v970_v6 }
 0x239   : > { %v993_v60 = vmul.f32 %v1872_v17, %v2710_v28  ;;  %v994_v31 = vmul.f32 %v1872_v17, %v2713_v29  ;;  %1883 = vrsqrt.f32 %v2892_v56  ;;  %v652_v0 = vpop.xlane.xlu0 %651  ;;  %vm1567_vm8 = vcmp.eq.f32.partialorder %v2892_v56, inf }
 0x23a   : > { %v1874_v50 = vpop.eup %1873  ;;  %1885 = vrcp.f32 %v986_v57  ;;  %v2903_v61 = vmul.f32 0.003921569, %v652_v0  ;;  %vm1569_vm9 = vcmp.eq.f32.partialorder %v2892_v56, 0.0 }
 0x23b   : > { %v1876_v1 = vpop.eup %1875  ;;  %v1003_v8 = vmul.f32 %v2879_v62, %v993_v60  ;;  %v1004_v28 = vmul.f32 %v2879_v62, %v994_v31  ;;  %v661_v29 = vmul.f32 %v1874_v50, %v2869_v9  ;;  %v952_v19 = vpop.xlane.xlu1 %951  ;;  %v1570_v60 = vand.u32 2147483648, %v2892_v56 }
 0x23c   : > { %v1878_v34 = vpop.eup %1877  ;;  %v1559_v52 = vmul.f32 %v1876_v1, %v2871_v43  ;;  %v2912_v32 = vmul.f32 0.003921569, %v952_v19  ;;  %1887 = vrsqrt.f32 %v2903_v61  ;;  %vm676_vm10 = vcmp.eq.f32.partialorder %v2903_v61, inf }
 0x23d   : > { %v1013_v63 = vadd.f32 %v2881_v10, %v1003_v8  ;;  %v1014_v51 = vadd.f32 %v2881_v10, %v1004_v28  ;;  %v1587_v54 = vmul.f32 %v1878_v34, %v2720_v59  ;;  %v1588_v45 = vmul.f32 %v1878_v34, %v2723_v24 }
 0x23e   : > { %v1880_v6 = vpop.eup %1879  ;;  %v663_v17 = vsel %vm662_vm0, %v2869_v9, %v661_v29  ;;  %v1561_v57 = vsel %vm1560_vm2, %v2871_v43, %v1559_v52  ;;  %1889 = vrsqrt.f32 %v2912_v32  ;;  %vm980_vm11 = vcmp.eq.f32.partialorder %v2912_v32, inf }
 0x23f   : > { %v1882_v59 = vpop.eup %1881  ;;  %v1788_v31 = vmul.f32 -1.442695, %v1013_v63  ;;  %v1789_v24 = vmul.f32 -1.442695, %v1014_v51  ;;  %v1597_v0 = vmul.f32 %v2884_v4, %v1587_v54  ;;  %v1598_v50 = vmul.f32 %v2884_v4, %v1588_v45 }
 0x240   : > { %v666_v1 = vsel %vm664_vm1, %v665_v41, %v663_v17  ;;  %v1564_v8 = vsel %vm1562_vm3, %v1563_v2, %v1561_v57  ;;  %v972_v28 = vmul.f32 %v1882_v59, %v2877_v27  ;;  %v668_v29 = vmul.f32 %v1880_v6, %v2875_v16 }
 0x241   : > { %1891 = vpow2.f32 %v1788_v31  ;;  %v1607_v19 = vadd.f32 %v2887_v25, %v1597_v0  ;;  %v1608_v34 = vadd.f32 %v2887_v25, %v1598_v50  ;;  %v688_v52 = vadd.f32 1e-05, %v666_v1 }
 0x242   : > { %1893 = vpow2.f32 %v1789_v24  ;;  %v1580_v63 = vadd.f32 1e-05, %v1564_v8  ;;  %v974_v9 = vsel %vm973_vm5, %v2877_v27, %v972_v28  ;;  %v670_v43 = vsel %vm669_vm4, %v2875_v16, %v668_v29 }
 0x243   : > { %v1884_v41 = vpop.eup %1883  ;;  %v1808_v2 = vmul.f32 -1.442695, %v1607_v19  ;;  %v1809_v51 = vmul.f32 -1.442695, %v1608_v34  ;;  %1895 = vrcp.f32 %v688_v52  ;;  %v977_v54 = vsel %vm975_vm6, %v976_v47, %v974_v9 }
 0x244   : > { %v1886_v45 = vpop.eup %1885  ;;  %1897 = vrcp.f32 %v1580_v63  ;;  %v987_v6 = vadd.f32 1e-05, %v977_v54  ;;  %v673_v17 = vsel %vm671_vm7, %v672_v44, %v670_v43  ;;  %v1566_v57 = vmul.f32 %v1884_v41, %v2892_v56 }
 0x245   : > { %1899 = vpow2.f32 %v1808_v2  ;;  %v995_v59 = vmul.f32 %v1886_v45, %v2730_v14  ;;  %v996_v31 = vmul.f32 %v1886_v45, %v2733_v20  ;;  %v689_v24 = vadd.f32 1e-05, %v673_v17  ;;  %v1546_v14 = vpop.xlane.xlu1 %1545 }
 0x246   : > { %v1888_v0 = vpop.eup %1887  ;;  %1901 = vpow2.f32 %v1809_v51  ;;  %v2956_v50 = vstv %s2920_s22  ;;  %v1568_v27 = vsel %vm1567_vm8, %v2892_v56, %v1566_v57  ;;  %v2965_v20 = vstv %s2932_s23 }
 0x247   : > { %v1005_v16 = vmul.f32 %v2879_v62, %v995_v59  ;;  %v1006_v47 = vmul.f32 %v2879_v62, %v996_v31  ;;  %1903 = vrcp.f32 %v987_v6  ;;  %v1571_v44 = vsel %vm1569_vm9, %v1570_v60, %v1568_v27 }
 0x248   : > { %v1890_v1 = vpop.eup %1889  ;;  %1905 = vrcp.f32 %v689_v24  ;;  %v1581_v8 = vadd.f32 1e-05, %v1571_v44  ;;  %v675_v28 = vmul.f32 %v1888_v0, %v2903_v61  ;;  %v983_v60 = vand.u32 2147483648, %v2912_v32 }
 0x249   : > { %v1015_v29 = vadd.f32 %v2881_v10, %v1005_v16  ;;  %v1016_v19 = vadd.f32 %v2881_v10, %v1006_v47  ;;  %v979_v56 = vmul.f32 %v1890_v1, %v2912_v32  ;;  %v2974_v34 = vmul.f32 0.003921569, %v1546_v14 }
 0x24a   : > { %1907 = vrcp.f32 %v1581_v8  ;;  %vm982_vm12 = vcmp.eq.f32.partialorder %v2912_v32, 0.0  ;;  %v677_v43 = vsel %vm676_vm10, %v2903_v61, %v675_v28  ;;  %v679_v57 = vand.u32 2147483648, %v2903_v61 }
 0x24b   : > { %v1892_v52 = vpop.eup %1891  ;;  %v1790_v63 = vmul.f32 -1.442695, %v1015_v29  ;;  %v981_v9 = vsel %vm980_vm11, %v2912_v32, %v979_v56  ;;  %v1791_v51 = vmul.f32 -1.442695, %v1016_v19  ;;  %1909 = vrsqrt.f32 %v2974_v34 }
 0x24c   : > { %v1894_v41 = vpop.eup %1893  ;;  %v1045_v2 = vadd.f32 1.0, %v1892_v52  ;;  %v984_v54 = vsel %vm982_vm12, %v983_v60, %v981_v9  ;;  %vm678_vm13 = vcmp.eq.f32.partialorder %v2903_v61, 0.0  ;;  %vm1574_vm14 = vcmp.eq.f32.partialorder %v2974_v34, inf }
 0x24d   : > { %v1896_v45 = vpop.eup %1895  ;;  %v1046_v6 = vadd.f32 1.0, %v1894_v41  ;;  %1911 = vpow2.f32 %v1790_v63  ;;  %v988_v17 = vadd.f32 1e-05, %v984_v54  ;;  %v2986_v16 = vsel %vm678_vm13, %v679_v57, %v677_v43 }
 0x24e   : > { %v1898_v59 = vpop.eup %1897  ;;  %1913 = vrcp.f32 %v1045_v2  ;;  %v696_v31 = vmul.f32 %v1896_v45, %v2740_v53  ;;  %v697_v32 = vmul.f32 %v1896_v45, %v2743_v23  ;;  %vm1576_vm15 = vcmp.eq.f32.partialorder %v2974_v34, 0.0 }
 0x24f   : > { %v1900_v24 = vpop.eup %1899  ;;  %1915 = vrcp.f32 %v1046_v6  ;;  %v1589_v0 = vmul.f32 %v1898_v59, %v2746_v33  ;;  %v1590_v27 = vmul.f32 %v1898_v59, %v2749_v18 }
 0x250   : > { %v1902_v47 = vpop.eup %1901  ;;  %v1639_v44 = vadd.f32 1.0, %v1900_v24  ;;  %1917 = vpow2.f32 %v1791_v51  ;;  %v706_v14 = vmul.f32 %v2956_v50, %v696_v31  ;;  %v707_v1 = vmul.f32 %v2956_v50, %v697_v32 }
 0x251   : > { %v1904_v53 = vpop.eup %1903  ;;  %v1640_v8 = vadd.f32 1.0, %v1902_v47  ;;  %v1599_v23 = vmul.f32 %v2884_v4, %v1589_v0  ;;  %v1600_v61 = vmul.f32 %v2884_v4, %v1590_v27  ;;  %1919 = vrcp.f32 %v988_v17  ;;  %v2061_v27 = vld [vmem:[%s2239_s12 + $0x10] sm:$0xc] }
 0x252   : > { %v1906_v28 = vpop.eup %1905  ;;  %1921 = vrcp.f32 %v1639_v44  ;;  %v716_v33 = vadd.f32 %v2965_v20, %v706_v14  ;;  %v717_v18 = vadd.f32 %v2965_v20, %v707_v1  ;;  %v997_v29 = vmul.f32 %v1904_v53, %v2766_v40  ;;  %v3020_v14 = vpop.xlane.xlu0 %654 }
 0x253   : > { %1923 = vrcp.f32 %v1640_v8  ;;  %v1609_v19 = vadd.f32 %v2887_v25, %v1599_v23  ;;  %v1610_v56 = vadd.f32 %v2887_v25, %v1600_v61  ;;  %v998_v60 = vmul.f32 %v1904_v53, %v2769_v46  ;;  %v2062_v53 = vld [vmem:[%s2239_s12 + $0x18] sm:$0xc] }
 0x254   : > { %v1908_v52 = vpop.eup %1907  ;;  %v1778_v63 = vmul.f32 -1.442695, %v716_v33  ;;  %v1779_v9 = vmul.f32 -1.442695, %v717_v18  ;;  %v1007_v43 = vmul.f32 %v2879_v62, %v997_v29  ;;  %v698_v41 = vmul.f32 %v1906_v28, %v2760_v7 }
 0x255   : > { %v1810_v2 = vmul.f32 -1.442695, %v1609_v19  ;;  %v1811_v51 = vmul.f32 -1.442695, %v1610_v56  ;;  %v1008_v54 = vmul.f32 %v2879_v62, %v998_v60  ;;  %v699_v40 = vmul.f32 %v1906_v28, %v2763_v26  ;;  %v3002_v45 = vpop.eup %1909 }
 0x256   : > { %1925 = vpow2.f32 %v1778_v63  ;;  %v1017_v46 = vadd.f32 %v2881_v10, %v1007_v43  ;;  %v708_v6 = vmul.f32 %v2956_v50, %v698_v41  ;;  %v1591_v17 = vmul.f32 %v1908_v52, %v2780_v37 }
 0x257   : > { %v1912_v57 = vpop.eup %1911  ;;  %1927 = vpow2.f32 %v1779_v9  ;;  %v1018_v7 = vadd.f32 %v2881_v10, %v1008_v54  ;;  %v709_v59 = vmul.f32 %v2956_v50, %v699_v40  ;;  %v1592_v31 = vmul.f32 %v1908_v52, %v2783_v13  ;;  %v2063_v9 = vld [vmem:[%s2239_s12 + $0x10] sm:$0xc0] }
 0x258   : > { %v1914_v26 = vpop.eup %1913  ;;  %v1047_v32 = vadd.f32 1.0, %v1912_v57  ;;  %1929 = vpow2.f32 %v1810_v2  ;;  %v1792_v24 = vmul.f32 -1.442695, %v1017_v46  ;;  %v718_v37 = vadd.f32 %v2965_v20, %v708_v6  ;;  %v1240_v6 = vpop.xlane.xlu0 %1239 }
 0x259   : > { %v1916_v0 = vpop.eup %1915  ;;  %v1069_v47 = vmul.f32 %v2061_v27, %v1914_v26  ;;  %1931 = vpow2.f32 %v1811_v51  ;;  %v1793_v44 = vmul.f32 -1.442695, %v1018_v7  ;;  %v719_v13 = vadd.f32 %v2965_v20, %v709_v59  ;;  %v2064_v51 = vld [vmem:[%s2239_s12 + $0x18] sm:$0xc0] }
 0x25a   : > { %v1918_v1 = vpop.eup %1917  ;;  %v1070_v8 = vmul.f32 %v2062_v53, %v1916_v0  ;;  %1933 = vrcp.f32 %v1047_v32  ;;  %v1780_v23 = vmul.f32 -1.442695, %v718_v37  ;;  %v1601_v61 = vmul.f32 %v2884_v4, %v1591_v17 }
 0x25b   : > { %v1920_v28 = vpop.eup %1919  ;;  %1077 = vst [vmem:[%s3015_s26 + $0x10] sm:$0xc] %v1069_v47  ;;  %v1048_v33 = vadd.f32 1.0, %v1918_v1  ;;  %1935 = vpow2.f32 %v1792_v24  ;;  %v1781_v18 = vmul.f32 -1.442695, %v719_v13  ;;  %v1602_v29 = vmul.f32 %v2884_v4, %v1592_v31 }
 0x25c   : > { %v1922_v19 = vpop.eup %1921  ;;  %1078 = vst [vmem:[%s3015_s26 + $0x18] sm:$0xc] %v1070_v8  ;;  %1937 = vpow2.f32 %v1793_v44  ;;  %v1611_v56 = vadd.f32 %v2887_v25, %v1601_v61  ;;  %v999_v60 = vmul.f32 %v1920_v28, %v2796_v38  ;;  %v1000_v52 = vmul.f32 %v1920_v28, %v2799_v35  ;;  %v2065_v44 = vld [vmem:[%s2239_s12 + $0x30] sm:$0xc]  ;;  %v1243_v1 = vpop.xlane.xlu0 %1242 }
 0x25d   : > { %v1924_v63 = vpop.eup %1923  ;;  %v1663_v43 = vmul.f32 %v2063_v9, %v1922_v19  ;;  %1939 = vrcp.f32 %v1048_v33  ;;  %v1612_v41 = vadd.f32 %v2887_v25, %v1602_v29  ;;  %v690_v2 = vadd.f32 1e-05, %v2986_v16 }
 0x25e   : > { %v1664_v54 = vmul.f32 %v2064_v51, %v1924_v63  ;;  %1941 = vpow2.f32 %v1780_v23  ;;  %v1812_v40 = vmul.f32 -1.442695, %v1611_v56  ;;  %v1009_v46 = vmul.f32 %v2879_v62, %v999_v60 }
 0x25f   : > { %1671 = vst [vmem:[%s3015_s26 + $0x10] sm:$0xc0] %v1663_v43  ;;  %1943 = vpow2.f32 %v1781_v18  ;;  %v1813_v38 = vmul.f32 -1.442695, %v1612_v41  ;;  %v1010_v35 = vmul.f32 %v2879_v62, %v1000_v52  ;;  %v1573_v16 = vmul.f32 %v3002_v45, %v2974_v34  ;;  %v2066_v18 = vld [vmem:[%s2239_s12 + $0x38] sm:$0xc] }
 0x260   : > { %v1926_v17 = vpop.eup %1925  ;;  %1672 = vst [vmem:[%s3015_s26 + $0x18] sm:$0xc0] %v1664_v54  ;;  %1945 = vpow2.f32 %v1812_v40  ;;  %v1019_v57 = vadd.f32 %v2881_v10, %v1009_v46  ;;  %v1577_v23 = vand.u32 2147483648, %v2974_v34  ;;  %v3051_v54 = vmul.f32 0.003921569, %v3020_v14 }
 0x261   : > { %v1928_v7 = vpop.eup %1927  ;;  %v748_v59 = vadd.f32 1.0, %v1926_v17  ;;  %1947 = vpow2.f32 %v1813_v38  ;;  %v1020_v32 = vadd.f32 %v2881_v10, %v1010_v35  ;;  %v1575_v45 = vsel %vm1574_vm14, %v2974_v34, %v1573_v16 }
 0x262   : > { %v1930_v31 = vpop.eup %1929  ;;  %v749_v26 = vadd.f32 1.0, %v1928_v7  ;;  %1949 = vrcp.f32 %v690_v2  ;;  %v1794_v37 = vmul.f32 -1.442695, %v1019_v57  ;;  %v1578_v19 = vsel %vm1576_vm15, %v1577_v23, %v1575_v45  ;;  %v1246_v2 = vpop.xlane.xlu0 %1245  ;;  %v2067_v57 = vld [vmem:[%s2239_s12 + $0x10] sm:$0x3] }
 0x263   : > { %v1932_v24 = vpop.eup %1931  ;;  %1951 = vrcp.f32 %v748_v59  ;;  %v1641_v62 = vadd.f32 1.0, %v1930_v31  ;;  %v1795_v8 = vmul.f32 -1.442695, %v1020_v32  ;;  %v1582_v41 = vadd.f32 1e-05, %v1578_v19 }
 0x264   : > { %v1934_v0 = vpop.eup %1933  ;;  %1953 = vrcp.f32 %v749_v26  ;;  %v1642_v27 = vadd.f32 1.0, %v1932_v24  ;;  %v3055_v35 = vmul.f32 0.003921569, %v1240_v6  ;;  %v3058_v59 = vmul.f32 0.003921569, %v1243_v1 }
 0x265   : > { %v1936_v47 = vpop.eup %1935  ;;  %v1071_v13 = vmul.f32 %v2065_v44, %v1934_v0  ;;  %1955 = vrcp.f32 %v1641_v62  ;;  %v3060_v14 = vmul.f32 0.003921569, %v1246_v2  ;;  %v2068_v31 = vld [vmem:[%s2239_s12 + $0x18] sm:$0x3]  ;;  %v2069_v32 = vld [vmem:[%s2239_s12 + $0x30] sm:$0xc0] }
 0x266   : > { %v1938_v10 = vpop.eup %1937  ;;  %1957 = vrcp.f32 %v1642_v27  ;;  %v1049_v53 = vadd.f32 1.0, %v1936_v47  ;;  %v1249_v44 = vpop.xlane.xlu0 %1248  ;;  %v2075_v2 = vld [vmem:[%s2239_s12 + $0x50] sm:$0xc0]  ;;  %vm683_vm0 = vcmp.eq.f32.partialorder %v3051_v54, inf  ;;  %vm685_vm1 = vcmp.eq.f32.partialorder %v3051_v54, 0.0 }
 0x267   : > { %v1940_v61 = vpop.eup %1939  ;;  %1079 = vst [vmem:[%s3015_s26 + $0x30] sm:$0xc] %v1071_v13  ;;  %v1050_v28 = vadd.f32 1.0, %v1938_v10  ;;  %1959 = vpow2.f32 %v1794_v37  ;;  %v2070_v37 = vld [vmem:[%s2239_s12 + $0x38] sm:$0xc0]  ;;  %vm1256_vm2 = vcmp.eq.f32.partialorder %v3055_v35, inf }
 0x268   : > { %v1942_v33 = vpop.eup %1941  ;;  %v1072_v29 = vmul.f32 %v2066_v18, %v1940_v61  ;;  %1961 = vrcp.f32 %v1049_v53  ;;  %v2071_v10 = vld [vmem:[%s2239_s12 + $0x50] sm:$0xc]  ;;  %v3079_v18 = vmul.f32 0.003921569, %v1249_v44  ;;  %vm1258_vm3 = vcmp.eq.f32.partialorder %v3055_v35, 0.0 }
 0x269   : > { %v1944_v56 = vpop.eup %1943  ;;  %1963 = vrcp.f32 %v1050_v28  ;;  %v750_v60 = vadd.f32 1.0, %v1942_v33  ;;  %v2072_v28 = vld [vmem:[%s2239_s12 + $0x58] sm:$0xc]  ;;  %vm1263_vm4 = vcmp.eq.f32.partialorder %v3058_v59, inf  ;;  %vm1265_vm5 = vcmp.eq.f32.partialorder %v3058_v59, 0.0 }
 0x26a   : > { %v1946_v52 = vpop.eup %1945  ;;  %1080 = vst [vmem:[%s3015_s26 + $0x38] sm:$0xc] %v1072_v29  ;;  %v751_v63 = vadd.f32 1.0, %v1944_v56  ;;  %1965 = vpow2.f32 %v1795_v8  ;;  %vm1270_vm6 = vcmp.eq.f32.partialorder %v3060_v14, inf  ;;  %vm1272_vm7 = vcmp.eq.f32.partialorder %v3060_v14, 0.0 }
 0x26b   : > { %v1948_v9 = vpop.eup %1947  ;;  %1967 = vrcp.f32 %v750_v60  ;;  %v1643_v43 = vadd.f32 1.0, %v1946_v52  ;;  %v2073_v60 = vld [vmem:[%s2239_s12 + $0x30] sm:$0x3]  ;;  %vm1277_vm8 = vcmp.eq.f32.partialorder %v3079_v18, inf  ;;  %vm1279_vm9 = vcmp.eq.f32.partialorder %v3079_v18, 0.0 }
 0x26c   : > { %v1950_v51 = vpop.eup %1949  ;;  %1969 = vrcp.f32 %v751_v63  ;;  %v1644_v34 = vadd.f32 1.0, %v1948_v9  ;;  %v2074_v9 = vld [vmem:[%s2239_s12 + $0x38] sm:$0x3] }
 0x26d   : > { %v1952_v40 = vpop.eup %1951  ;;  %1971 = vrcp.f32 %v1643_v43  ;;  %v700_v46 = vmul.f32 %v1950_v51, %v2790_v42  ;;  %v701_v38 = vmul.f32 %v1950_v51, %v2793_v36 }
 0x26e   : > { %v1954_v17 = vpop.eup %1953  ;;  %v772_v7 = vmul.f32 %v2067_v57, %v1952_v40  ;;  %1973 = vrcp.f32 %v1644_v34  ;;  %v2076_v40 = vld [vmem:[%s2239_s12 + $0x58] sm:$0xc0] }
 0x26f   : > { %v1956_v16 = vpop.eup %1955  ;;  %v773_v26 = vmul.f32 %v2068_v31, %v1954_v17  ;;  %v710_v42 = vmul.f32 %v2956_v50, %v700_v46  ;;  %v711_v36 = vmul.f32 %v2956_v50, %v701_v38  ;;  %1975 = vrcp.f32 %v1582_v41 }
 0x270   : > { %v1958_v6 = vpop.eup %1957  ;;  %780 = vst [vmem:[%s3015_s26 + $0x10] sm:$0x3] %v772_v7  ;;  %v1665_v24 = vmul.f32 %v2069_v32, %v1956_v16  ;;  %1977 = vrsqrt.f32 %v3051_v54  ;;  %v686_v38 = vand.u32 2147483648, %v3051_v54 }
 0x271   : > { %v1960_v62 = vpop.eup %1959  ;;  %781 = vst [vmem:[%s3015_s26 + $0x18] sm:$0x3] %v773_v26  ;;  %v1666_v0 = vmul.f32 %v2070_v37, %v1958_v6  ;;  %v720_v27 = vadd.f32 %v2965_v20, %v710_v42  ;;  %v721_v47 = vadd.f32 %v2965_v20, %v711_v36  ;;  %1979 = vrsqrt.f32 %v3055_v35 }
 0x272   : > { %v1962_v13 = vpop.eup %1961  ;;  %1673 = vst [vmem:[%s3015_s26 + $0x30] sm:$0xc0] %v1665_v24  ;;  %v1051_v45 = vadd.f32 1.0, %v1960_v62  ;;  %1981 = vrsqrt.f32 %v3058_v59  ;;  %v1259_v6 = vand.u32 2147483648, %v3055_v35 }
 0x273   : > { %v1964_v1 = vpop.eup %1963  ;;  %1674 = vst [vmem:[%s3015_s26 + $0x38] sm:$0xc0] %v1666_v0  ;;  %v1073_v53 = vmul.f32 %v2071_v10, %v1962_v13  ;;  %v1782_v8 = vmul.f32 -1.442695, %v720_v27  ;;  %v1783_v23 = vmul.f32 -1.442695, %v721_v47  ;;  %1983 = vrsqrt.f32 %v3060_v14 }
 0x274   : > { %v1966_v61 = vpop.eup %1965  ;;  %v1074_v33 = vmul.f32 %v2072_v28, %v1964_v1  ;;  %1985 = vrcp.f32 %v1051_v45  ;;  %v1266_v27 = vand.u32 2147483648, %v3058_v59  ;;  %v2077_v10 = vld [vmem:[%s2239_s12 + $0x70] sm:$0xc] }
 0x275   : > { %v1968_v29 = vpop.eup %1967  ;;  %1081 = vst [vmem:[%s3015_s26 + $0x50] sm:$0xc] %v1073_v53  ;;  %v1052_v19 = vadd.f32 1.0, %v1966_v61  ;;  %1987 = vpow2.f32 %v1782_v8 }
 0x276   : > { %v1970_v56 = vpop.eup %1969  ;;  %1082 = vst [vmem:[%s3015_s26 + $0x58] sm:$0xc] %v1074_v33  ;;  %v774_v52 = vmul.f32 %v2073_v60, %v1968_v29  ;;  %1989 = vpow2.f32 %v1783_v23  ;;  %v2078_v60 = vld [vmem:[%s2239_s12 + $0x78] sm:$0xc] }
 0x277   : > { %v1972_v63 = vpop.eup %1971  ;;  %v775_v43 = vmul.f32 %v2074_v9, %v1970_v56  ;;  %1991 = vrcp.f32 %v1052_v19 }
 0x278   : > { %v1974_v41 = vpop.eup %1973  ;;  %782 = vst [vmem:[%s3015_s26 + $0x30] sm:$0x3] %v774_v52  ;;  %v1667_v51 = vmul.f32 %v2075_v2, %v1972_v63  ;;  %1993 = vrsqrt.f32 %v3079_v18 }
 0x279   : > { %v1976_v34 = vpop.eup %1975  ;;  %783 = vst [vmem:[%s3015_s26 + $0x38] sm:$0x3] %v775_v43  ;;  %v1668_v46 = vmul.f32 %v2076_v40, %v1974_v41  ;;  %v462_v17 = vpop.f32.mrb[0].mxu1  ;;  %v1273_v43 = vand.u32 2147483648, %v3060_v14 }
 0x27a   : > { %v1978_v57 = vpop.eup %1977  ;;  %1675 = vst [vmem:[%s3015_s26 + $0x50] sm:$0xc0] %v1667_v51  ;;  %v1593_v7 = vmul.f32 %v1976_v34, %v2810_v58  ;;  %v1594_v16 = vmul.f32 %v1976_v34, %v2813_v5  ;;  %v1777_v31 = vmul.f32 -1.442695, %v462_v17  ;;  %v1833_v26 = vpop.f32.mrb[1].mxu1  ;;  %v1280_v51 = vand.u32 2147483648, %v3079_v18 }
 0x27b   : > { %v1980_v42 = vpop.eup %1979  ;;  %1676 = vst [vmem:[%s3015_s26 + $0x58] sm:$0xc0] %v1668_v46  ;;  %v682_v36 = vmul.f32 %v1978_v57, %v3051_v54 }
 0x27c   : > { %v1982_v32 = vpop.eup %1981  ;;  %v1603_v58 = vmul.f32 %v2884_v4, %v1593_v7  ;;  %v1604_v5 = vmul.f32 %v2884_v4, %v1594_v16  ;;  %v1255_v24 = vmul.f32 %v1980_v42, %v3055_v35  ;;  %1995 = vpow2.f32 %v1777_v31  ;;  %v2079_v42 = vld [vmem:[%s2239_s12 + $0x50] sm:$0x3] }
 0x27d   : > { %v1984_v62 = vpop.eup %1983  ;;  %v684_v37 = vsel %vm683_vm0, %v3051_v54, %v682_v36  ;;  %v1262_v0 = vmul.f32 %v1982_v32, %v3058_v59  ;;  %v2080_v32 = vld [vmem:[%s2239_s12 + $0x58] sm:$0x3] }
 0x27e   : > { %v1986_v47 = vpop.eup %1985  ;;  %v1613_v44 = vadd.f32 %v2887_v25, %v1603_v58  ;;  %v1614_v4 = vadd.f32 %v2887_v25, %v1604_v5  ;;  %v687_v13 = vsel %vm685_vm1, %v686_v38, %v684_v37  ;;  %v1257_v45 = vsel %vm1256_vm2, %v3055_v35, %v1255_v24 }
 0x27f   : > { %v1988_v1 = vpop.eup %1987  ;;  %v1075_v53 = vmul.f32 %v2077_v10, %v1986_v47  ;;  %v691_v8 = vadd.f32 1e-05, %v687_v13  ;;  %v1260_v23 = vsel %vm1258_vm3, %v1259_v6, %v1257_v45  ;;  %v1264_v61 = vsel %vm1263_vm4, %v3058_v59, %v1262_v0 }
 0x280   : > { %v1990_v25 = vpop.eup %1989  ;;  %v752_v28 = vadd.f32 1.0, %v1988_v1  ;;  %v1814_v54 = vmul.f32 -1.442695, %v1613_v44  ;;  %v1267_v33 = vsel %vm1265_vm5, %v1266_v27, %v1264_v61  ;;  %v1815_v56 = vmul.f32 -1.442695, %v1614_v4 }
 0x281   : > { %v1992_v29 = vpop.eup %1991  ;;  %1083 = vst [vmem:[%s3015_s26 + $0x70] sm:$0xc] %v1075_v53  ;;  %v753_v19 = vadd.f32 1.0, %v1990_v25  ;;  %1997 = vrcp.f32 %v691_v8  ;;  %v1282_v63 = vadd.f32 1e-05, %v1260_v23  ;;  %v1269_v9 = vmul.f32 %v1984_v62, %v3060_v14 }
 0x282   : > { %v1994_v35 = vpop.eup %1993  ;;  %v1076_v52 = vmul.f32 %v2078_v60, %v1992_v29  ;;  %1999 = vrcp.f32 %v752_v28  ;;  %v1283_v59 = vadd.f32 1e-05, %v1267_v33  ;;  %v1299_v0 = vstv %s1796_s27 }
 0x283   : > { %2001 = vrcp.f32 %v753_v19  ;;  %v1276_v41 = vmul.f32 %v1994_v35, %v3079_v18  ;;  %v1271_v2 = vsel %vm1270_vm6, %v3060_v14, %v1269_v9  ;;  %v1309_v27 = vstv %s1797_s28 }
 0x284   : > { %1084 = vst [vmem:[%s3015_s26 + $0x78] sm:$0xc] %v1076_v52  ;;  %2003 = vpow2.f32 %v1814_v54  ;;  %v1274_v34 = vsel %vm1272_vm7, %v1273_v43, %v1271_v2  ;;  %v474_v13 = vsub.s32 0, %v2412_v48  ;;  %v488_v10 = vsub.s32 2, %v2412_v48 }
 0x285   : > { %2005 = vpow2.f32 %v1815_v56  ;;  %v1278_v40 = vsel %vm1277_vm8, %v3079_v18, %v1276_v41  ;;  %v1284_v38 = vadd.f32 1e-05, %v1274_v34 }
 0x286   : > { %v1996_v46 = vpop.eup %1995  ;;  %2007 = vrcp.f32 %v1282_v63  ;;  %v1281_v17 = vsel %vm1279_vm9, %v1280_v51, %v1278_v40 }
 0x287   : > { %2009 = vrcp.f32 %v1283_v59  ;;  %v1285_v57 = vadd.f32 1e-05, %v1281_v17  ;;  %v469_v7 = vadd.f32 1.0, %v1996_v46 }
 0x288   : > { %2011 = vrcp.f32 %v1284_v38 }
 0x289   : > { %2013 = vrcp.f32 %v1285_v57 }
 0x28a   : > { %2015 = vrcp.f32 %v469_v7 }
 0x28b   : > { %v1998_v14 = vpop.eup %1997 }
 0x28c   : > { %v2000_v16 = vpop.eup %1999  ;;  %v702_v31 = vmul.f32 %v1998_v14, %v2816_v12  ;;  %v703_v18 = vmul.f32 %v1998_v14, %v2819_v55  ;;  %v481_v12 = vsub.s32 1, %v2412_v48 }
 0x28d   : > { %v2002_v26 = vpop.eup %2001  ;;  %v776_v36 = vmul.f32 %v2079_v42, %v2000_v16  ;;  %v2081_v16 = vld [vmem:[%s2239_s12 + $0x70] sm:$0xc0] }
 0x28e   : > { %v2004_v6 = vpop.eup %2003  ;;  %v777_v58 = vmul.f32 %v2080_v32, %v2002_v26  ;;  %v712_v5 = vmul.f32 %v2956_v50, %v702_v31  ;;  %v713_v24 = vmul.f32 %v2956_v50, %v703_v18  ;;  %v2082_v26 = vld [vmem:[%s2239_s12 + $0x78] sm:$0xc0] }
 0x28f   : > { %v2006_v62 = vpop.eup %2005  ;;  %784 = vst [vmem:[%s3015_s26 + $0x50] sm:$0x3] %v776_v36  ;;  %v1645_v37 = vadd.f32 1.0, %v2004_v6  ;;  %v495_v6 = vsub.s32 3, %v2412_v48 }
 0x290   : > { %v2008_v55 = vpop.eup %2007  ;;  %785 = vst [vmem:[%s3015_s26 + $0x58] sm:$0x3] %v777_v58  ;;  %v1646_v47 = vadd.f32 1.0, %v2006_v62  ;;  %v722_v44 = vadd.f32 %v2965_v20, %v712_v5  ;;  %v723_v4 = vadd.f32 %v2965_v20, %v713_v24 }
 0x291   : > { %v2010_v45 = vpop.eup %2009  ;;  %2017 = vrcp.f32 %v1645_v37  ;;  %v1290_v50 = vmul.f32 %v2008_v55, %v2830_v11  ;;  %v1291_v1 = vmul.f32 %v2008_v55, %v2833_v3 }
 0x292   : > { %v2012_v53 = vpop.eup %2011  ;;  %2019 = vrcp.f32 %v1646_v47  ;;  %v1784_v8 = vmul.f32 -1.442695, %v722_v44  ;;  %v1785_v23 = vmul.f32 -1.442695, %v723_v4  ;;  %v1292_v61 = vmul.f32 %v2010_v45, %v2840_v22 }
 0x293   : > { %v2014_v25 = vpop.eup %2013  ;;  %v1300_v28 = vmul.f32 %v1299_v0, %v1290_v50  ;;  %v1301_v54 = vmul.f32 %v1299_v0, %v1291_v1  ;;  %v1293_v20 = vmul.f32 %v2010_v45, %v2843_v30  ;;  %v1294_v33 = vmul.f32 %v2012_v53, %v2850_v49 }
 0x294   : > { %2021 = vpow2.f32 %v1784_v8  ;;  %v1302_v29 = vmul.f32 %v1299_v0, %v1292_v61  ;;  %v1295_v11 = vmul.f32 %v2012_v53, %v2853_v39  ;;  %v1296_v3 = vmul.f32 %v2014_v25, %v2860_v21  ;;  %v2016_v60 = vpop.eup %2015 }
 0x295   : > { %2023 = vpow2.f32 %v1785_v23  ;;  %v1310_v19 = vadd.f32 %v1309_v27, %v1300_v28  ;;  %v1311_v56 = vadd.f32 %v1309_v27, %v1301_v54  ;;  %v1303_v35 = vmul.f32 %v1299_v0, %v1293_v20  ;;  %v2084_v54 = vld [vmem:[%s2239_s12 + $0x78] sm:$0x3] }
 0x296   : > { %v1312_v52 = vadd.f32 %v1309_v27, %v1302_v29  ;;  %v1304_v22 = vmul.f32 %v1299_v0, %v1294_v33  ;;  %v1305_v63 = vmul.f32 %v1299_v0, %v1295_v11  ;;  %v1297_v9 = vmul.f32 %v2014_v25, %v2863_v15  ;;  %v2083_v25 = vld [vmem:[%s2239_s12 + $0x70] sm:$0x3]  ;;  %v2085_v11 = vld [vmem:[%s2239_s12 + $0x10] sm:$0x30] }
 0x297   : > { %v1798_v59 = vmul.f32 -1.442695, %v1310_v19  ;;  %v1799_v30 = vmul.f32 -1.442695, %v1311_v56  ;;  %v1313_v43 = vadd.f32 %v1309_v27, %v1303_v35  ;;  %v1306_v49 = vmul.f32 %v1299_v0, %v1296_v3  ;;  %v2086_v56 = vld [vmem:[%s2239_s12 + $0x18] sm:$0x30] }
 0x298   : > { %v1800_v41 = vmul.f32 -1.442695, %v1312_v52  ;;  %v1314_v2 = vadd.f32 %v1309_v27, %v1304_v22  ;;  %v1315_v51 = vadd.f32 %v1309_v27, %v1305_v63  ;;  %v1307_v39 = vmul.f32 %v1299_v0, %v1297_v9  ;;  %v2087_v52 = vld [vmem:[%s2239_s12 + $0x30] sm:$0x30]  ;;  %v2088_v9 = vld [vmem:[%s2239_s12 + $0x38] sm:$0x30] }
 0x299   : > { %2025 = vpow2.f32 %v1798_v59  ;;  %v1801_v21 = vmul.f32 -1.442695, %v1313_v43  ;;  %v1316_v34 = vadd.f32 %v1309_v27, %v1306_v49  ;;  %v482_v40 = vrot.slane %v2016_v60, %v481_v12  ;;  %v2089_v43 = vld [vmem:[%s2239_s12 + $0x50] sm:$0x30] }
 0x29a   : > { %2027 = vpow2.f32 %v1799_v30  ;;  %v1802_v46 = vmul.f32 -1.442695, %v1314_v2  ;;  %v1803_v38 = vmul.f32 -1.442695, %v1315_v51  ;;  %v1317_v17 = vadd.f32 %v1309_v27, %v1307_v39  ;;  %v2090_v2 = vld [vmem:[%s2239_s12 + $0x58] sm:$0x30] }
 0x29b   : > { %v2018_v57 = vpop.eup %2017  ;;  %2029 = vpow2.f32 %v1800_v41  ;;  %v1804_v15 = vmul.f32 -1.442695, %v1316_v34  ;;  %484 = vbcast.lane.b32.xlu1 %v482_v40, 256  ;;  %v475_v7 = vrot.slane %v2016_v60, %v474_v13  ;;  %v489_v36 = vrot.slane %v2016_v60, %v488_v10  ;;  %v2092_v40 = vld [vmem:[%s2239_s12 + $0x78] sm:$0x30] }
 0x29c   : > { %v2020_v14 = vpop.eup %2019  ;;  %v1669_v31 = vmul.f32 %v2081_v16, %v2018_v57  ;;  %2031 = vpow2.f32 %v1801_v21  ;;  %v1805_v18 = vmul.f32 -1.442695, %v1317_v17  ;;  %v496_v62 = vrot.slane %v2016_v60, %v495_v6  ;;  %v2091_v21 = vld [vmem:[%s2239_s12 + $0x70] sm:$0x30]  ;;  %v2093_v17 = vld [vmem:[%s2239_s12 + $0x20] sm:$0xff] }
 0x29d   : > { %v1670_v42 = vmul.f32 %v2082_v26, %v2020_v14  ;;  %2033 = vpow2.f32 %v1802_v46  ;;  %477 = vbcast.lane.b32.xlu0 %v475_v7, 256  ;;  %v2095_v16 = vld [vmem:[%s2239_s12] sm:$0xff] }
 0x29e   : > { %v2022_v32 = vpop.eup %2021  ;;  %1677 = vst [vmem:[%s3015_s26 + $0x70] sm:$0xc0] %v1669_v31  ;;  %2035 = vpow2.f32 %v1803_v38 }
 0x29f   : > { %v2024_v58 = vpop.eup %2023  ;;  %1678 = vst [vmem:[%s3015_s26 + $0x78] sm:$0xc0] %v1670_v42  ;;  %v754_v5 = vadd.f32 1.0, %v2022_v32  ;;  %2037 = vpow2.f32 %v1804_v15  ;;  %491 = vbcast.lane.b32.xlu1 %v489_v36, 256  ;;  %v2094_v15 = vld [vmem:[%s2239_s12 + $0x28] sm:$0xff]  ;;  %v2097_v36 = vld [vmem:[%s2239_s12 + $0x40] sm:$0xff] }
 0x2a0   : > { %v755_v24 = vadd.f32 1.0, %v2024_v58  ;;  %2039 = vpow2.f32 %v1805_v18  ;;  %v2096_v18 = vld [vmem:[%s2239_s12 + $0x8] sm:$0xff] }
 0x2a1   : > { %2041 = vrcp.f32 %v754_v5  ;;  %v2098_v32 = vld [vmem:[%s2239_s12 + $0x48] sm:$0xff] }
 0x2a2   : > { %2043 = vrcp.f32 %v755_v24  ;;  %v2099_v24 = vld [vmem:[%s2239_s12 + $0x60] sm:$0xff] }
 0x2a3   : > { %v2026_v37 = vpop.eup %2025  ;;  %498 = vbcast.lane.b32.xlu1 %v496_v62, 256 }
 0x2a4   : > { %v2028_v0 = vpop.eup %2027  ;;  %v1342_v27 = vadd.f32 1.0, %v2026_v37  ;;  %v2100_v37 = vld [vmem:[%s2239_s12 + $0x68] sm:$0xff] }
 0x2a5   : > { %v2030_v12 = vpop.eup %2029  ;;  %v1343_v55 = vadd.f32 1.0, %v2028_v0 }
 0x2a6   : > { %v2032_v48 = vpop.eup %2031  ;;  %2045 = vrcp.f32 %v1342_v27  ;;  %v1344_v47 = vadd.f32 1.0, %v2030_v12 }
 0x2a7   : > { %v2034_v44 = vpop.eup %2033  ;;  %2047 = vrcp.f32 %v1343_v55  ;;  %v1345_v4 = vadd.f32 1.0, %v2032_v48 }
 0x2a8   : > { %v2036_v13 = vpop.eup %2035  ;;  %2049 = vrcp.f32 %v1344_v47  ;;  %v1346_v45 = vadd.f32 1.0, %v2034_v44 }
 0x2a9   : > { %v2038_v50 = vpop.eup %2037  ;;  %2051 = vrcp.f32 %v1345_v4  ;;  %v1347_v1 = vadd.f32 1.0, %v2036_v13 }
 0x2aa   : > { %v2040_v10 = vpop.eup %2039  ;;  %2053 = vrcp.f32 %v1346_v45  ;;  %v1348_v53 = vadd.f32 1.0, %v2038_v50 }
 0x2ab   : > { %v2042_v8 = vpop.eup %2041  ;;  %2055 = vrcp.f32 %v1347_v1  ;;  %v1349_v23 = vadd.f32 1.0, %v2040_v10 }
 0x2ac   : > { %v2044_v61 = vpop.eup %2043  ;;  %v778_v28 = vmul.f32 %v2083_v25, %v2042_v8  ;;  %2057 = vrcp.f32 %v1348_v53 }
 0x2ad   : > { %v779_v20 = vmul.f32 %v2084_v54, %v2044_v61  ;;  %2059 = vrcp.f32 %v1349_v23 }
 0x2ae   : > { %786 = vst [vmem:[%s3015_s26 + $0x70] sm:$0x3] %v778_v28 }
 0x2af   : > { %787 = vst [vmem:[%s3015_s26 + $0x78] sm:$0x3] %v779_v20 }
 0x2b0   : > { %v2046_v33 = vpop.eup %2045 }
 0x2b1   : > { %v2048_v29 = vpop.eup %2047  ;;  %v1366_v3 = vmul.f32 %v2085_v11, %v2046_v33 }
 0x2b2   : > { %v2050_v19 = vpop.eup %2049  ;;  %v1367_v35 = vmul.f32 %v2086_v56, %v2048_v29 }
 0x2b3   : > { %v2052_v60 = vpop.eup %2051  ;;  %1374 = vst [vmem:[%s3015_s26 + $0x10] sm:$0x30] %v1366_v3  ;;  %v1368_v22 = vmul.f32 %v2087_v52, %v2050_v19 }
 0x2b4   : > { %v2054_v63 = vpop.eup %2053  ;;  %1375 = vst [vmem:[%s3015_s26 + $0x18] sm:$0x30] %v1367_v35  ;;  %v1369_v59 = vmul.f32 %v2088_v9, %v2052_v60 }
 0x2b5   : > { %v2056_v30 = vpop.eup %2055  ;;  %1376 = vst [vmem:[%s3015_s26 + $0x30] sm:$0x30] %v1368_v22  ;;  %v1370_v49 = vmul.f32 %v2089_v43, %v2054_v63 }
 0x2b6   : > { %v2058_v41 = vpop.eup %2057  ;;  %1377 = vst [vmem:[%s3015_s26 + $0x38] sm:$0x30] %v1369_v59  ;;  %v1371_v51 = vmul.f32 %v2090_v2, %v2056_v30 }
 0x2b7   : > { %v2060_v39 = vpop.eup %2059  ;;  %1378 = vst [vmem:[%s3015_s26 + $0x50] sm:$0x30] %v1370_v49  ;;  %v1372_v34 = vmul.f32 %v2091_v21, %v2058_v41 }
 0x2b8   : > { %1379 = vst [vmem:[%s3015_s26 + $0x58] sm:$0x30] %v1371_v51  ;;  %v1373_v46 = vmul.f32 %v2092_v40, %v2060_v39 }
 0x2b9   : > { %1380 = vst [vmem:[%s3015_s26 + $0x70] sm:$0x30] %v1372_v34 }
 0x2ba   : > { %1381 = vst [vmem:[%s3015_s26 + $0x78] sm:$0x30] %v1373_v46 }
 0x30d   : > { %v485_v38 = vpop.permute.xlu1 %484 }
 0x30e   : > { %v502_v57 = vmul.f32 %v2093_v17, %v485_v38  ;;  %v503_v7 = vmul.f32 %v2094_v15, %v485_v38 }
 0x30f   : > { %v478_v14 = vpop.permute.xlu0 %477 }
 0x310   : > { %v500_v31 = vmul.f32 %v2095_v16, %v478_v14  ;;  %v501_v26 = vmul.f32 %v2096_v18, %v478_v14  ;;  %510 = vst [vmem:[%s3015_s26 + $0x20] sm:$0xff] %v502_v57  ;;  %511 = vst [vmem:[%s3015_s26 + $0x28] sm:$0xff] %v503_v7 }
 0x311   : > { %v492_v42 = vpop.permute.xlu1 %491 }
 0x312   : > { %508 = vst [vmem:[%s3015_s26] sm:$0xff] %v500_v31  ;;  %509 = vst [vmem:[%s3015_s26 + $0x8] sm:$0xff] %v501_v26  ;;  %v504_v6 = vmul.f32 %v2097_v36, %v492_v42  ;;  %v505_v58 = vmul.f32 %v2098_v32, %v492_v42 }
 0x314   : > { %512 = vst [vmem:[%s3015_s26 + $0x40] sm:$0xff] %v504_v6  ;;  %513 = vst [vmem:[%s3015_s26 + $0x48] sm:$0xff] %v505_v58 }
 0x315   : > { %v499_v5 = vpop.permute.xlu1 %498 }
 0x316   : > { %v506_v62 = vmul.f32 %v2099_v24, %v499_v5  ;;  %v507_v0 = vmul.f32 %v2100_v37, %v499_v5 }
 0x318   : > { %514 = vst [vmem:[%s3015_s26 + $0x60] sm:$0xff] %v506_v62  ;;  %515 = vst [vmem:[%s3015_s26 + $0x68] sm:$0xff] %v507_v0 }
 0x319 PF: > { %s17_s18 = sadd.s32 1, %s2145_s18  }
 0x31a   : > { %p14_p3 = scmp.ge.s32.totalorder %s17_s18, 4  }
 0x31c   :  { %16 = sbr.rel (!%p14_p3) target bundleno = 2 (0x2), region = 79 }
 0x323   :  { %1703 = vsyncpa [#allocation3], 1 }
 0x324   :  { %1705 = vsyncpa [#allocation3 + $0x1], 1 }
 0x325   :  { %1706 = vsyncpa [#allocation5], 1 }

</bundles_post_ra>
